<compile_context>
chip_gen: v7x
topology: tpu7x:2x2x1
jax: 0.10.0
libtpu: 0.0.40
codegen_flags: <defaults>
</compile_context>

<pallas_src>
import math
import functools

import jax
import jax.numpy as jnp
from jax.experimental import pallas as pl
from jax.experimental.pallas import tpu as pltpu


# ----------------------------- kernel helpers -------------------------------

def _layernorm(x, gamma, beta, eps=1e-5):
    mu = jnp.mean(x, axis=-1, keepdims=True)
    var = jnp.mean((x - mu) ** 2, axis=-1, keepdims=True)
    return (x - mu) * jax.lax.rsqrt(var + eps) * gamma + beta


def _gelu(x):
    # original BERT gelu: x * 0.5 * (1 + erf(x / sqrt(2)))
    return x * 0.5 * (1.0 + jax.lax.erf(x / math.sqrt(2.0)))


# ------------------------------- the kernel ---------------------------------

def stage_block_kernel(x_ref, noise_ref, ln1_g_ref, ln1_b_ref,
                       wq_ref, wk_ref, wv_ref, wp_ref, rb_ref, projb_ref,
                       ln2_g_ref, ln2_b_ref, fc1w_ref, fc1b_ref, fc2w_ref, fc2b_ref,
                       o_ref, xr_ref, *, batch_tile, compute_dtype):
    d = pl.program_id(1)                 # depth (innermost, "arbitrary")
    M, C = xr_ref.shape                  # M = Bt * N flattened tokens
    H, _, hd = wq_ref.shape
    N = M // batch_tile
    f32_path = jnp.dtype(compute_dtype) == jnp.dtype(jnp.float32)

    # first layer of this batch tile: bring x into the resident f32 VMEM carry
    @pl.when(d == 0)
    def _():
        xr_ref[...] = x_ref[...].astype(jnp.float32)

    x = xr_ref[...]                                        # (M, C) f32 residual source

    # ---- norm1 + per-token noise (Attention adds the noise to its own input) ----
    h = _layernorm(x, ln1_g_ref[...], ln1_b_ref[...])
    h = h + noise_ref[...]                                 # (M, 1), pre-scaled by noise_strength_1
    hm = h.astype(compute_dtype)                           # single cast (no-op on the f32 path)

    # ---- attention: per-head, per-batch-element; no masks, no broadcasts ----
    attn = jnp.zeros((M, C), jnp.float32)
    for head in range(H):                                  # static unroll, H is small
        # projections contract over C on the flat token slab (big MXU M dim);
        # scale is folded into wq at pack time.
        q = jnp.dot(hm, wq_ref[head], preferred_element_type=compute_dtype)   # (M, hd)
        k = jnp.dot(hm, wk_ref[head], preferred_element_type=compute_dtype)
        v = jnp.dot(hm, wv_ref[head], preferred_element_type=compute_dtype)
        qb = q.reshape(batch_tile, N, hd)
        kb = k.reshape(batch_tile, N, hd)
        vb = v.reshape(batch_tile, N, hd)

        s = jnp.einsum('bnd,bmd->bnm', qb, kb,
                       preferred_element_type=jnp.float32)                    # (Bt, N, N)
        s = s + rb_ref[head]                               # rel-pos bias (N, N), bcast over b
        s = s - jnp.max(s, axis=-1, keepdims=True)         # max in f32 always

        if f32_path:
            p = jnp.exp(s)                                                     # f32 EUP (v5e-safe)
            denom = jnp.sum(p, axis=-1, keepdims=True)
        else:
            p = jnp.exp(s.astype(compute_dtype))                               # bf16 EUP (v6e/v7x)
            denom = jnp.sum(p.astype(jnp.float32), axis=-1, keepdims=True)     # f32 accumulation

        pv = jnp.einsum('bnm,bmd->bnd', p.astype(compute_dtype), vb,
                        preferred_element_type=jnp.float32)                    # (Bt, N, hd)
        # softmax 1/sum folded into the small PV output; reciprocal runs on the EUP
        pv = pv * pl.reciprocal(denom, approx=not f32_path)

        attn = attn + jnp.dot(pv.reshape(M, hd).astype(compute_dtype), wp_ref[head],
                              preferred_element_type=jnp.float32)              # (M, C) accum

    attn = attn + projb_ref[...]
    x1 = attn + x                                          # attention residual

    # ---- norm2 + MLP, then doubled:  x = mlp(norm2(x1)); x = x + drop_path(x) ----
    y = _layernorm(x1, ln2_g_ref[...], ln2_b_ref[...]).astype(compute_dtype)
    m = jnp.dot(y, fc1w_ref[...], preferred_element_type=jnp.float32) + fc1b_ref[...]
    m = _gelu(m).astype(compute_dtype)
    m = jnp.dot(m, fc2w_ref[...], preferred_element_type=jnp.float32) + fc2b_ref[...]
    x_new = 2.0 * m                                        # (M, C) f32

    xr_ref[...] = x_new                                    # carry to next Block

    @pl.when(d == pl.num_programs(1) - 1)
    def _():
        o_ref[...] = x_new.astype(o_ref.dtype)             # single (Bt*N, C) slab store


# ------------------------------ wrapper / glue -------------------------------

def make_rel_bias(table, window_size):
    # relative_position_index = (i - j) + window_size - 1  -> gather from table
    coords = jnp.arange(window_size)
    rel = coords[:, None] - coords[None, :] + window_size - 1            # (ws, ws)
    bias = table[rel.reshape(-1)].reshape(window_size, window_size, -1)  # (ws, ws, H)
    return jnp.transpose(bias, (2, 0, 1))                                # (H, ws, ws)


def pack_stage_params(params_list, window_size, compute_dtype=jnp.float32):
    """Stack per-layer params on a leading depth axis in the layouts the kernel consumes:
    Wq/Wk/Wv as (H, C, hd) (qk scale folded into Wq), Wproj as (H, hd, C)."""
    H = params_list[0]['num_heads']
    C = params_list[0]['qkv_w'].shape[1]
    hd = C // H
    scale = hd ** (-0.5)
    N = window_size

    def one(p):
        Wqkv = p['qkv_w']                                 # (3C, C) torch layout (out, in)
        Wq, Wk, Wv = Wqkv[:C], Wqkv[C:2 * C], Wqkv[2 * C:]
        wq = jnp.transpose(Wq.reshape(H, hd, C), (0, 2, 1)) * scale          # (H, C, hd)
        wk = jnp.transpose(Wk.reshape(H, hd, C), (0, 2, 1))                  # (H, C, hd)
        wv = jnp.transpose(Wv.reshape(H, hd, C), (0, 2, 1))                  # (H, C, hd)
        wp = p['proj_w'].T.reshape(H, hd, C)                                 # (H, hd, C)
        rel = make_rel_bias(p['rel_table'], N)                               # (H, N, N)
        return dict(
            ln1_g=p['g1'].reshape(1, C), ln1_b=p['b1'].reshape(1, C),
            wq=wq.astype(compute_dtype), wk=wk.astype(compute_dtype),
            wv=wv.astype(compute_dtype), wp=wp.astype(compute_dtype),
            rel_bias=rel.astype(jnp.float32),
            proj_b=p['proj_b'].reshape(1, C),
            ln2_g=p['g2'].reshape(1, C), ln2_b=p['b2'].reshape(1, C),
            fc1_w=p['fc1_w'].T.astype(compute_dtype),                        # (C, hidden)
            fc1_b=p['fc1_b'].reshape(1, -1),
            fc2_w=p['fc2_w'].T.astype(compute_dtype),                        # (hidden, C)
            fc2_b=p['fc2_b'].reshape(1, C),
        )

    packs = [one(p) for p in params_list]
    return {k: jnp.stack([pk[k] for pk in packs], axis=0) for k in packs[0]}


def stage_block_apply(x, packed, noise, *, batch_tile=None, compute_dtype=jnp.float32):
    """x: (B, N, C); noise: (depth, B, N, 1) already scaled by each layer's noise_strength_1."""
    B, N, C = x.shape
    depth, H = packed['wq'].shape[0], packed['wq'].shape[1]
    hd = packed['wq'].shape[3]
    hidden = packed['fc1_w'].shape[-1]

    # Default tiling keeps nbt a multiple of 2 so the "parallel" batch-tile axis shards
    # across both v7x TensorCores (no effect on single-TC v5e/v6e).  Grow batch_tile up to
    # the VMEM budget to amortize per-layer weight re-streaming (weights re-DMA'd nbt times).
    Bt = batch_tile if batch_tile is not None else (B // 2 if B % 2 == 0 else B)
    assert B % Bt == 0
    nbt = B // Bt
    M = Bt * N

    x2 = x.reshape(B * N, C)
    noise2 = noise.reshape(depth, B * N, 1)

    kernel = functools.partial(stage_block_kernel, batch_tile=Bt,
                               compute_dtype=compute_dtype)

    def dspec(shape):  # per-depth streamed block (depth dim squeezed out)
        nd = len(shape)
        return pl.BlockSpec((None,) + shape,
                            lambda b, d, _nd=nd: (d,) + (0,) * _nd)

    in_specs = [
        pl.BlockSpec((M, C), lambda b, d: (b, 0)),           # x, flattened tokens
        pl.BlockSpec((None, M, 1), lambda b, d: (d, b, 0)),  # per-layer noise
        dspec((1, C)), dspec((1, C)),                        # ln1 gamma / beta
        dspec((H, C, hd)), dspec((H, C, hd)), dspec((H, C, hd)),  # Wq (scaled), Wk, Wv
        dspec((H, hd, C)),                                   # Wproj
        dspec((H, N, N)),                                    # relative-position bias only
        dspec((1, C)),                                       # proj bias
        dspec((1, C)), dspec((1, C)),                        # ln2 gamma / beta
        dspec((C, hidden)), dspec((1, hidden)),              # fc1 weight / bias
        dspec((hidden, C)), dspec((1, C)),                   # fc2 weight / bias
    ]

    # Explicit scoped-VMEM limit derived from the per-step working set (double-buffered
    # streamed blocks + f32 carry + attention/MLP temps), clamped for v7x's 64 MiB VMEM.
    wbytes = jnp.dtype(compute_dtype).itemsize
    weight_bytes = (4 * C * C + 2 * C * hidden) * wbytes + (H * N * N + 6 * C + hidden) * 4
    stream_bytes = 2 * (weight_bytes + M * C * x.dtype.itemsize + M * 4)   # double-buffered
    temp_bytes = (3 * M * C + 2 * Bt * N * N + 2 * M * hidden) * 4
    est = stream_bytes + M * C * 4 + M * C * x.dtype.itemsize + temp_bytes
    vmem_limit = int(min(max(2 * est, 8 << 20), 48 << 20))

    out = pl.pallas_call(
        kernel,
        out_shape=jax.ShapeDtypeStruct((B * N, C), x.dtype),
        grid=(nbt, depth),
        in_specs=in_specs,
        out_specs=pl.BlockSpec((M, C), lambda b, d: (b, 0)),
        scratch_shapes=[pltpu.VMEM((M, C), jnp.float32)],    # resident activation carry
        compiler_params=pltpu.CompilerParams(
            dimension_semantics=("parallel", "arbitrary"),
            vmem_limit_bytes=vmem_limit),
    )(x2, noise2, packed['ln1_g'], packed['ln1_b'],
      packed['wq'], packed['wk'], packed['wv'], packed['wp'],
      packed['rel_bias'], packed['proj_b'], packed['ln2_g'], packed['ln2_b'],
      packed['fc1_w'], packed['fc1_b'], packed['fc2_w'], packed['fc2_b'])
    return out.reshape(B, N, C)


def init_block_params(key, dim, num_heads, mlp_ratio, window_size):
    """Parameters kept in PyTorch nn.Linear layout (out_features, in_features)."""
    hidden = int(dim * mlp_ratio)
    ks = jax.random.split(key, 5)
    return dict(
        num_heads=num_heads,
        g1=jnp.ones((dim,), jnp.float32), b1=jnp.zeros((dim,), jnp.float32),
        qkv_w=jax.random.normal(ks[0], (3 * dim, dim), jnp.float32) * 0.02,  # qkv_bias=False
        rel_table=jax.random.normal(ks[1], (2 * window_size - 1, num_heads), jnp.float32) * 0.02,
        proj_w=jax.random.normal(ks[2], (dim, dim), jnp.float32) * 0.02,
        proj_b=jnp.zeros((dim,), jnp.float32),
        g2=jnp.ones((dim,), jnp.float32), b2=jnp.zeros((dim,), jnp.float32),
        fc1_w=jax.random.normal(ks[3], (hidden, dim), jnp.float32) * 0.02,
        fc1_b=jnp.zeros((hidden,), jnp.float32),
        fc2_w=jax.random.normal(ks[4], (dim, hidden), jnp.float32) * 0.02,
        fc2_b=jnp.zeros((dim,), jnp.float32),
        noise_strength=jnp.zeros((), jnp.float32),   # nn.Parameter(torch.zeros([]))
    )


# ------------------------- pure-JAX reference (standard math) ----------------

def block_ref(x, noise, p, window_size):
    B, N, C = x.shape
    H = p['num_heads']
    hd = C // H
    scale = hd ** (-0.5)

    def ln(z, g, b):
        mu = z.mean(-1, keepdims=True)
        var = ((z - mu) ** 2).mean(-1, keepdims=True)
        return (z - mu) / jnp.sqrt(var + 1e-5) * g + b

    h = ln(x, p['g1'], p['b1']) + noise
    qkv = (h @ p['qkv_w'].T).reshape(B, N, 3, H, hd).transpose(2, 0, 3, 1, 4)
    q, k, v = qkv[0], qkv[1], qkv[2]
    attn = jnp.einsum('bhnd,bhmd->bhnm', q, k) * scale
    attn = attn + make_rel_bias(p['rel_table'], window_size)[None]
    attn = jax.nn.softmax(attn, axis=-1)
    o = jnp.einsum('bhnm,bhmd->bhnd', attn, v).transpose(0, 2, 1, 3).reshape(B, N, C)
    o = o @ p['proj_w'].T + p['proj_b']
    x1 = o + x
    y = ln(x1, p['g2'], p['b2'])
    m = y @ p['fc1_w'].T + p['fc1_b']
    m = m * 0.5 * (1.0 + jax.lax.erf(m / math.sqrt(2.0)))
    m = m @ p['fc2_w'].T + p['fc2_b']
    return 2.0 * m


# ----------------------------------- main ------------------------------------

if __name__ == "__main__":
    key = jax.random.PRNGKey(0)
    depth = 2
    B, dim, num_heads, window_size, mlp_ratio = 2, 32, 4, 16, 4.0
    N = window_size   # relative position bias requires N == window_size

    kx, kp, kn = jax.random.split(key, 3)
    x = jax.random.normal(kx, (B, N, dim), jnp.float32)
    params_list = [init_block_params(jax.random.fold_in(kp, i),
                                     dim, num_heads, mlp_ratio, window_size)
                   for i in range(depth)]
    # exercise the noise path (noise_strength_1 is a learnable scalar, 0 at torch init)
    params_list[0]['noise_strength'] = jnp.float32(0.05)

    # torch draws fresh randn([B, N, 1]) per Block each forward; draw it host-side,
    # pre-scaled by each layer's noise_strength_1, so it is deterministic & checkable.
    noise = jnp.stack([
        jax.random.normal(jax.random.fold_in(kn, i), (B, N, 1), jnp.float32)
        * p['noise_strength'] for i, p in enumerate(params_list)], axis=0)   # (depth, B, N, 1)

    # pure-JAX reference of the same forward pass (standard per-head math, f32)
    ref = x
    for i, p in enumerate(params_list):
        ref = block_ref(ref, noise[i], p, window_size)

    # ---- exact-precision run (f32 matmuls) + tight check; nbt=2 exercises megacore path ----
    packed_f32 = pack_stage_params(params_list, window_size, compute_dtype=jnp.float32)
    out = stage_block_apply(x, packed_f32, noise, batch_tile=1,
                            compute_dtype=jnp.float32)
    out = jax.block_until_ready(out)
    assert out.shape == (B, N, dim)
    err = float(jnp.max(jnp.abs(out - ref)))
    assert err < 2e-4, f"f32 kernel mismatch vs reference: max abs err = {err}"

    # ---- bf16-matmul run (v6e/v7x MXU-native path); loose sanity check ----
    packed_bf16 = pack_stage_params(params_list, window_size, compute_dtype=jnp.bfloat16)
    out_bf = jax.block_until_ready(
        stage_block_apply(x, packed_bf16, noise, batch_tile=1,
                          compute_dtype=jnp.bfloat16))
    err_bf = float(jnp.max(jnp.abs(out_bf - ref)))
    assert bool(jnp.all(jnp.isfinite(out_bf))) and err_bf < 5e-2, \
        f"bf16 kernel sanity check failed: max abs err = {err_bf}"

    print("KERNEL_OK")
</pallas_src>

<mosaic_0001>
module attributes {stable_mosaic.version = 11 : i64} {
  func.func @stage_block_kernel(%arg0: i32, %arg1: i32, %arg2: memref<16x32xf32, #tpu.memory_space<vmem>>, %arg3: memref<1x16x1xf32, #tpu.memory_space<vmem>>, %arg4: memref<1x1x32xf32, #tpu.memory_space<vmem>>, %arg5: memref<1x1x32xf32, #tpu.memory_space<vmem>>, %arg6: memref<1x4x32x8xf32, #tpu.memory_space<vmem>>, %arg7: memref<1x4x32x8xf32, #tpu.memory_space<vmem>>, %arg8: memref<1x4x32x8xf32, #tpu.memory_space<vmem>>, %arg9: memref<1x4x8x32xf32, #tpu.memory_space<vmem>>, %arg10: memref<1x4x16x16xf32, #tpu.memory_space<vmem>>, %arg11: memref<1x1x32xf32, #tpu.memory_space<vmem>>, %arg12: memref<1x1x32xf32, #tpu.memory_space<vmem>>, %arg13: memref<1x1x32xf32, #tpu.memory_space<vmem>>, %arg14: memref<1x32x128xf32, #tpu.memory_space<vmem>>, %arg15: memref<1x1x128xf32, #tpu.memory_space<vmem>>, %arg16: memref<1x128x32xf32, #tpu.memory_space<vmem>>, %arg17: memref<1x1x32xf32, #tpu.memory_space<vmem>>, %arg18: memref<16x32xf32, #tpu.memory_space<vmem>>, %arg19: memref<16x32xf32, #tpu.memory_space<vmem>>) attributes {dimension_semantics = [#tpu.dimension_semantics<parallel>, #tpu.dimension_semantics<arbitrary>], iteration_bounds = array<i64: 2, 2>, scalar_prefetch = 0 : i64, scratch_operands = 1 : i64, tpu.core_type = #tpu.core_type<tc>, window_params = [{transform_indices = @transform_0, window_bounds = array<i64: 16, 32>}, {transform_indices = @transform_1, window_bounds = array<i64: 1, 16, 1>}, {transform_indices = @transform_2, window_bounds = array<i64: 1, 1, 32>}, {transform_indices = @transform_3, window_bounds = array<i64: 1, 1, 32>}, {transform_indices = @transform_4, window_bounds = array<i64: 1, 4, 32, 8>}, {transform_indices = @transform_5, window_bounds = array<i64: 1, 4, 32, 8>}, {transform_indices = @transform_6, window_bounds = array<i64: 1, 4, 32, 8>}, {transform_indices = @transform_7, window_bounds = array<i64: 1, 4, 8, 32>}, {transform_indices = @transform_8, window_bounds = array<i64: 1, 4, 16, 16>}, {transform_indices = @transform_9, window_bounds = array<i64: 1, 1, 32>}, {transform_indices = @transform_10, window_bounds = array<i64: 1, 1, 32>}, {transform_indices = @transform_11, window_bounds = array<i64: 1, 1, 32>}, {transform_indices = @transform_12, window_bounds = array<i64: 1, 32, 128>}, {transform_indices = @transform_13, window_bounds = array<i64: 1, 1, 128>}, {transform_indices = @transform_14, window_bounds = array<i64: 1, 128, 32>}, {transform_indices = @transform_15, window_bounds = array<i64: 1, 1, 32>}, {transform_indices = @transform_16, window_bounds = array<i64: 16, 32>}]} {
    %c0_i32 = arith.constant 0 : i32
    %0 = arith.cmpi eq, %arg1, %c0_i32 : i32
    %1 = arith.extui %0 : i1 to i32
    %c0_i32_0 = arith.constant 0 : i32
    %2 = arith.cmpi ne, %1, %c0_i32_0 : i32
    scf.if %2 {
      %c0_160 = arith.constant 0 : index
      %c0_161 = arith.constant 0 : index
      %226 = vector.load %arg2[%c0_160, %c0_161] : memref<16x32xf32, #tpu.memory_space<vmem>>, vector<16x32xf32>
      %c0_162 = arith.constant 0 : index
      %c0_163 = arith.constant 0 : index
      %227 = vector.load %arg19[%c0_162, %c0_163] : memref<16x32xf32, #tpu.memory_space<vmem>>, vector<16x32xf32>
      tpu.vector_store %arg19[%c0_162, %c0_163], %226 {strides = array<i32>} : memref<16x32xf32, #tpu.memory_space<vmem>>, vector<16x32xf32>,
    } else {
    }
    %c0 = arith.constant 0 : index
    %c0_1 = arith.constant 0 : index
    %3 = vector.load %arg19[%c0, %c0_1] : memref<16x32xf32, #tpu.memory_space<vmem>>, vector<16x32xf32>
    %c0_2 = arith.constant 0 : index
    %c0_3 = arith.constant 0 : index
    %c0_4 = arith.constant 0 : index
    %4 = vector.load %arg4[%c0_2, %c0_3, %c0_4] : memref<1x1x32xf32, #tpu.memory_space<vmem>>, vector<1x1x32xf32>
    %5 = vector.shape_cast %4 : vector<1x1x32xf32> to vector<1x32xf32>
    %c0_5 = arith.constant 0 : index
    %c0_6 = arith.constant 0 : index
    %c0_7 = arith.constant 0 : index
    %6 = vector.load %arg5[%c0_5, %c0_6, %c0_7] : memref<1x1x32xf32, #tpu.memory_space<vmem>>, vector<1x1x32xf32>
    %7 = vector.shape_cast %6 : vector<1x1x32xf32> to vector<1x32xf32>
    %cst = arith.constant dense<0.000000e+00> : vector<16xf32>
    %8 = vector.multi_reduction <add>, %3, %cst [1] : vector<16x32xf32> to vector<16xf32>
    %9 = vector.shape_cast %8 : vector<16xf32> to vector<16x1xf32>
    %cst_8 = arith.constant 3.200000e+01 : f32
    %10 = vector.broadcast %cst_8 : f32 to vector<16x1xf32>
    %11 = arith.divf %9, %10 : vector<16x1xf32>
    %12 = vector.broadcast %11 : vector<16x1xf32> to vector<16x32xf32>
    %13 = arith.subf %3, %12 : vector<16x32xf32>
    %14 = arith.mulf %13, %13 : vector<16x32xf32>
    %cst_9 = arith.constant dense<0.000000e+00> : vector<16xf32>
    %15 = vector.multi_reduction <add>, %14, %cst_9 [1] : vector<16x32xf32> to vector<16xf32>
    %16 = vector.shape_cast %15 : vector<16xf32> to vector<16x1xf32>
    %cst_10 = arith.constant 3.200000e+01 : f32
    %17 = vector.broadcast %cst_10 : f32 to vector<16x1xf32>
    %18 = arith.divf %16, %17 : vector<16x1xf32>
    %19 = vector.broadcast %11 : vector<16x1xf32> to vector<16x32xf32>
    %20 = arith.subf %3, %19 : vector<16x32xf32>
    %cst_11 = arith.constant 9.99999974E-6 : f32
    %21 = vector.broadcast %cst_11 : f32 to vector<16x1xf32>
    %22 = arith.addf %18, %21 : vector<16x1xf32>
    %23 = math.rsqrt %22 : vector<16x1xf32>
    %24 = vector.broadcast %23 : vector<16x1xf32> to vector<16x32xf32>
    %25 = arith.mulf %20, %24 : vector<16x32xf32>
    %26 = vector.broadcast %5 : vector<1x32xf32> to vector<16x32xf32>
    %27 = arith.mulf %25, %26 : vector<16x32xf32>
    %28 = vector.broadcast %7 : vector<1x32xf32> to vector<16x32xf32>
    %29 = arith.addf %27, %28 : vector<16x32xf32>
    %c0_12 = arith.constant 0 : index
    %c0_13 = arith.constant 0 : index
    %c0_14 = arith.constant 0 : index
    %30 = vector.load %arg3[%c0_12, %c0_13, %c0_14] : memref<1x16x1xf32, #tpu.memory_space<vmem>>, vector<1x16x1xf32>
    %31 = vector.shape_cast %30 : vector<1x16x1xf32> to vector<16x1xf32>
    %32 = vector.broadcast %31 : vector<16x1xf32> to vector<16x32xf32>
    %33 = arith.addf %29, %32 : vector<16x32xf32>
    %cst_15 = arith.constant 0.000000e+00 : f32
    %34 = vector.broadcast %cst_15 : f32 to vector<16x32xf32>
    %c0_16 = arith.constant 0 : index
    %c0_17 = arith.constant 0 : index
    %c0_18 = arith.constant 0 : index
    %c0_19 = arith.constant 0 : index
    %35 = vector.load %arg6[%c0_16, %c0_17, %c0_18, %c0_19] : memref<1x4x32x8xf32, #tpu.memory_space<vmem>>, vector<1x1x32x8xf32>
    %36 = vector.shape_cast %35 : vector<1x1x32x8xf32> to vector<32x8xf32>
    %cst_20 = arith.constant dense<0.000000e+00> : vector<16x8xf32>
    %37 = tpu.matmul %33, %36, %cst_20 {dimension_numbers = #tpu.dot_dimension_numbers<[1], [0], [0], [1], [0, 0, 1, 1], [], []>} : vector<16x32xf32>, vector<32x8xf32>, vector<16x8xf32> -> vector<16x8xf32>
    %c0_21 = arith.constant 0 : index
    %c0_22 = arith.constant 0 : index
    %c0_23 = arith.constant 0 : index
    %c0_24 = arith.constant 0 : index
    %38 = vector.load %arg7[%c0_21, %c0_22, %c0_23, %c0_24] : memref<1x4x32x8xf32, #tpu.memory_space<vmem>>, vector<1x1x32x8xf32>
    %39 = vector.shape_cast %38 : vector<1x1x32x8xf32> to vector<32x8xf32>
    %cst_25 = arith.constant dense<0.000000e+00> : vector<16x8xf32>
    %40 = tpu.matmul %33, %39, %cst_25 {dimension_numbers = #tpu.dot_dimension_numbers<[1], [0], [0], [1], [0, 0, 1, 1], [], []>} : vector<16x32xf32>, vector<32x8xf32>, vector<16x8xf32> -> vector<16x8xf32>
    %c0_26 = arith.constant 0 : index
    %c0_27 = arith.constant 0 : index
    %c0_28 = arith.constant 0 : index
    %c0_29 = arith.constant 0 : index
    %41 = vector.load %arg8[%c0_26, %c0_27, %c0_28, %c0_29] : memref<1x4x32x8xf32, #tpu.memory_space<vmem>>, vector<1x1x32x8xf32>
    %42 = vector.shape_cast %41 : vector<1x1x32x8xf32> to vector<32x8xf32>
    %cst_30 = arith.constant dense<0.000000e+00> : vector<16x8xf32>
    %43 = tpu.matmul %33, %42, %cst_30 {dimension_numbers = #tpu.dot_dimension_numbers<[1], [0], [0], [1], [0, 0, 1, 1], [], []>} : vector<16x32xf32>, vector<32x8xf32>, vector<16x8xf32> -> vector<16x8xf32>
    %44 = vector.shape_cast %37 : vector<16x8xf32> to vector<1x16x8xf32>
    %45 = vector.shape_cast %40 : vector<16x8xf32> to vector<1x16x8xf32>
    %46 = vector.shape_cast %43 : vector<16x8xf32> to vector<1x16x8xf32>
    "tpu.trace_start"() <{level = 10 : i32, message = "bnd,bmd->bnm"}> : () -> ()
    %cst_31 = arith.constant dense<0.000000e+00> : vector<1x16x16xf32>
    %47 = tpu.matmul %44, %45, %cst_31 {dimension_numbers = #tpu.dot_dimension_numbers<[2], [2], [1], [1], [0, 0, 0, 1, 1, 1], [0], [0]>} : vector<1x16x8xf32>, vector<1x16x8xf32>, vector<1x16x16xf32> -> vector<1x16x16xf32>
    "tpu.trace_stop"() : () -> ()
    %c0_32 = arith.constant 0 : index
    %c0_33 = arith.constant 0 : index
    %c0_34 = arith.constant 0 : index
    %c0_35 = arith.constant 0 : index
    %48 = vector.load %arg10[%c0_32, %c0_33, %c0_34, %c0_35] : memref<1x4x16x16xf32, #tpu.memory_space<vmem>>, vector<1x1x16x16xf32>
    %49 = vector.shape_cast %48 : vector<1x1x16x16xf32> to vector<16x16xf32>
    %50 = vector.shape_cast %49 : vector<16x16xf32> to vector<1x16x16xf32>
    %51 = arith.addf %47, %50 : vector<1x16x16xf32>
    %cst_36 = arith.constant dense<0xFF800000> : vector<1x16xf32>
    %52 = vector.multi_reduction <maximumf>, %51, %cst_36 [2] : vector<1x16x16xf32> to vector<1x16xf32>
    %53 = vector.shape_cast %52 : vector<1x16xf32> to vector<1x16x1xf32>
    %54 = vector.broadcast %53 : vector<1x16x1xf32> to vector<1x16x16xf32>
    %55 = arith.subf %51, %54 : vector<1x16x16xf32>
    %56 = math.exp %55 : vector<1x16x16xf32>
    %cst_37 = arith.constant dense<0.000000e+00> : vector<1x16xf32>
    %57 = vector.multi_reduction <add>, %56, %cst_37 [2] : vector<1x16x16xf32> to vector<1x16xf32>
    %58 = vector.shape_cast %57 : vector<1x16xf32> to vector<1x16x1xf32>
    "tpu.trace_start"() <{level = 10 : i32, message = "bnm,bmd->bnd"}> : () -> ()
    %cst_38 = arith.constant dense<0.000000e+00> : vector<1x16x8xf32>
    %59 = tpu.matmul %56, %46, %cst_38 {dimension_numbers = #tpu.dot_dimension_numbers<[2], [1], [1], [2], [0, 0, 0, 1, 1, 2], [0], [0]>} : vector<1x16x16xf32>, vector<1x16x8xf32>, vector<1x16x8xf32> -> vector<1x16x8xf32>
    "tpu.trace_stop"() : () -> ()
    %60 = tpu.reciprocal %58 : vector<1x16x1xf32> -> vector<1x16x1xf32>
    %61 = vector.broadcast %60 : vector<1x16x1xf32> to vector<1x16x8xf32>
    %62 = arith.mulf %59, %61 : vector<1x16x8xf32>
    %63 = vector.shape_cast %62 : vector<1x16x8xf32> to vector<16x8xf32>
    %c0_39 = arith.constant 0 : index
    %c0_40 = arith.constant 0 : index
    %c0_41 = arith.constant 0 : index
    %c0_42 = arith.constant 0 : index
    %64 = vector.load %arg9[%c0_39, %c0_40, %c0_41, %c0_42] : memref<1x4x8x32xf32, #tpu.memory_space<vmem>>, vector<1x1x8x32xf32>
    %65 = vector.shape_cast %64 : vector<1x1x8x32xf32> to vector<8x32xf32>
    %cst_43 = arith.constant dense<0.000000e+00> : vector<16x32xf32>
    %66 = tpu.matmul %63, %65, %cst_43 {dimension_numbers = #tpu.dot_dimension_numbers<[1], [0], [0], [1], [0, 0, 1, 1], [], []>} : vector<16x8xf32>, vector<8x32xf32>, vector<16x32xf32> -> vector<16x32xf32>
    %67 = arith.addf %34, %66 : vector<16x32xf32>
    %c0_44 = arith.constant 0 : index
    %c1 = arith.constant 1 : index
    %c0_45 = arith.constant 0 : index
    %c0_46 = arith.constant 0 : index
    %68 = vector.load %arg6[%c0_44, %c1, %c0_45, %c0_46] : memref<1x4x32x8xf32, #tpu.memory_space<vmem>>, vector<1x1x32x8xf32>
    %69 = vector.shape_cast %68 : vector<1x1x32x8xf32> to vector<32x8xf32>
    %cst_47 = arith.constant dense<0.000000e+00> : vector<16x8xf32>
    %70 = tpu.matmul %33, %69, %cst_47 {dimension_numbers = #tpu.dot_dimension_numbers<[1], [0], [0], [1], [0, 0, 1, 1], [], []>} : vector<16x32xf32>, vector<32x8xf32>, vector<16x8xf32> -> vector<16x8xf32>
    %c0_48 = arith.constant 0 : index
    %c1_49 = arith.constant 1 : index
    %c0_50 = arith.constant 0 : index
    %c0_51 = arith.constant 0 : index
    %71 = vector.load %arg7[%c0_48, %c1_49, %c0_50, %c0_51] : memref<1x4x32x8xf32, #tpu.memory_space<vmem>>, vector<1x1x32x8xf32>
    %72 = vector.shape_cast %71 : vector<1x1x32x8xf32> to vector<32x8xf32>
    %cst_52 = arith.constant dense<0.000000e+00> : vector<16x8xf32>
    %73 = tpu.matmul %33, %72, %cst_52 {dimension_numbers = #tpu.dot_dimension_numbers<[1], [0], [0], [1], [0, 0, 1, 1], [], []>} : vector<16x32xf32>, vector<32x8xf32>, vector<16x8xf32> -> vector<16x8xf32>
    %c0_53 = arith.constant 0 : index
    %c1_54 = arith.constant 1 : index
    %c0_55 = arith.constant 0 : index
    %c0_56 = arith.constant 0 : index
    %74 = vector.load %arg8[%c0_53, %c1_54, %c0_55, %c0_56] : memref<1x4x32x8xf32, #tpu.memory_space<vmem>>, vector<1x1x32x8xf32>
    %75 = vector.shape_cast %74 : vector<1x1x32x8xf32> to vector<32x8xf32>
    %cst_57 = arith.constant dense<0.000000e+00> : vector<16x8xf32>
    %76 = tpu.matmul %33, %75, %cst_57 {dimension_numbers = #tpu.dot_dimension_numbers<[1], [0], [0], [1], [0, 0, 1, 1], [], []>} : vector<16x32xf32>, vector<32x8xf32>, vector<16x8xf32> -> vector<16x8xf32>
    %77 = vector.shape_cast %70 : vector<16x8xf32> to vector<1x16x8xf32>
    %78 = vector.shape_cast %73 : vector<16x8xf32> to vector<1x16x8xf32>
    %79 = vector.shape_cast %76 : vector<16x8xf32> to vector<1x16x8xf32>
    "tpu.trace_start"() <{level = 10 : i32, message = "bnd,bmd->bnm"}> : () -> ()
    %cst_58 = arith.constant dense<0.000000e+00> : vector<1x16x16xf32>
    %80 = tpu.matmul %77, %78, %cst_58 {dimension_numbers = #tpu.dot_dimension_numbers<[2], [2], [1], [1], [0, 0, 0, 1, 1, 1], [0], [0]>} : vector<1x16x8xf32>, vector<1x16x8xf32>, vector<1x16x16xf32> -> vector<1x16x16xf32>
    "tpu.trace_stop"() : () -> ()
    %c0_59 = arith.constant 0 : index
    %c1_60 = arith.constant 1 : index
    %c0_61 = arith.constant 0 : index
    %c0_62 = arith.constant 0 : index
    %81 = vector.load %arg10[%c0_59, %c1_60, %c0_61, %c0_62] : memref<1x4x16x16xf32, #tpu.memory_space<vmem>>, vector<1x1x16x16xf32>
    %82 = vector.shape_cast %81 : vector<1x1x16x16xf32> to vector<16x16xf32>
    %83 = vector.shape_cast %82 : vector<16x16xf32> to vector<1x16x16xf32>
    %84 = arith.addf %80, %83 : vector<1x16x16xf32>
    %cst_63 = arith.constant dense<0xFF800000> : vector<1x16xf32>
    %85 = vector.multi_reduction <maximumf>, %84, %cst_63 [2] : vector<1x16x16xf32> to vector<1x16xf32>
    %86 = vector.shape_cast %85 : vector<1x16xf32> to vector<1x16x1xf32>
    %87 = vector.broadcast %86 : vector<1x16x1xf32> to vector<1x16x16xf32>
    %88 = arith.subf %84, %87 : vector<1x16x16xf32>
    %89 = math.exp %88 : vector<1x16x16xf32>
    %cst_64 = arith.constant dense<0.000000e+00> : vector<1x16xf32>
    %90 = vector.multi_reduction <add>, %89, %cst_64 [2] : vector<1x16x16xf32> to vector<1x16xf32>
    %91 = vector.shape_cast %90 : vector<1x16xf32> to vector<1x16x1xf32>
    "tpu.trace_start"() <{level = 10 : i32, message = "bnm,bmd->bnd"}> : () -> ()
    %cst_65 = arith.constant dense<0.000000e+00> : vector<1x16x8xf32>
    %92 = tpu.matmul %89, %79, %cst_65 {dimension_numbers = #tpu.dot_dimension_numbers<[2], [1], [1], [2], [0, 0, 0, 1, 1, 2], [0], [0]>} : vector<1x16x16xf32>, vector<1x16x8xf32>, vector<1x16x8xf32> -> vector<1x16x8xf32>
    "tpu.trace_stop"() : () -> ()
    %93 = tpu.reciprocal %91 : vector<1x16x1xf32> -> vector<1x16x1xf32>
    %94 = vector.broadcast %93 : vector<1x16x1xf32> to vector<1x16x8xf32>
    %95 = arith.mulf %92, %94 : vector<1x16x8xf32>
    %96 = vector.shape_cast %95 : vector<1x16x8xf32> to vector<16x8xf32>
    %c0_66 = arith.constant 0 : index
    %c1_67 = arith.constant 1 : index
    %c0_68 = arith.constant 0 : index
    %c0_69 = arith.constant 0 : index
    %97 = vector.load %arg9[%c0_66, %c1_67, %c0_68, %c0_69] : memref<1x4x8x32xf32, #tpu.memory_space<vmem>>, vector<1x1x8x32xf32>
    %98 = vector.shape_cast %97 : vector<1x1x8x32xf32> to vector<8x32xf32>
    %cst_70 = arith.constant dense<0.000000e+00> : vector<16x32xf32>
    %99 = tpu.matmul %96, %98, %cst_70 {dimension_numbers = #tpu.dot_dimension_numbers<[1], [0], [0], [1], [0, 0, 1, 1], [], []>} : vector<16x8xf32>, vector<8x32xf32>, vector<16x32xf32> -> vector<16x32xf32>
    %100 = arith.addf %67, %99 : vector<16x32xf32>
    %c0_71 = arith.constant 0 : index
    %c2 = arith.constant 2 : index
    %c0_72 = arith.constant 0 : index
    %c0_73 = arith.constant 0 : index
    %101 = vector.load %arg6[%c0_71, %c2, %c0_72, %c0_73] : memref<1x4x32x8xf32, #tpu.memory_space<vmem>>, vector<1x1x32x8xf32>
    %102 = vector.shape_cast %101 : vector<1x1x32x8xf32> to vector<32x8xf32>
    %cst_74 = arith.constant dense<0.000000e+00> : vector<16x8xf32>
    %103 = tpu.matmul %33, %102, %cst_74 {dimension_numbers = #tpu.dot_dimension_numbers<[1], [0], [0], [1], [0, 0, 1, 1], [], []>} : vector<16x32xf32>, vector<32x8xf32>, vector<16x8xf32> -> vector<16x8xf32>
    %c0_75 = arith.constant 0 : index
    %c2_76 = arith.constant 2 : index
    %c0_77 = arith.constant 0 : index
    %c0_78 = arith.constant 0 : index
    %104 = vector.load %arg7[%c0_75, %c2_76, %c0_77, %c0_78] : memref<1x4x32x8xf32, #tpu.memory_space<vmem>>, vector<1x1x32x8xf32>
    %105 = vector.shape_cast %104 : vector<1x1x32x8xf32> to vector<32x8xf32>
    %cst_79 = arith.constant dense<0.000000e+00> : vector<16x8xf32>
    %106 = tpu.matmul %33, %105, %cst_79 {dimension_numbers = #tpu.dot_dimension_numbers<[1], [0], [0], [1], [0, 0, 1, 1], [], []>} : vector<16x32xf32>, vector<32x8xf32>, vector<16x8xf32> -> vector<16x8xf32>
    %c0_80 = arith.constant 0 : index
    %c2_81 = arith.constant 2 : index
    %c0_82 = arith.constant 0 : index
    %c0_83 = arith.constant 0 : index
    %107 = vector.load %arg8[%c0_80, %c2_81, %c0_82, %c0_83] : memref<1x4x32x8xf32, #tpu.memory_space<vmem>>, vector<1x1x32x8xf32>
    %108 = vector.shape_cast %107 : vector<1x1x32x8xf32> to vector<32x8xf32>
    %cst_84 = arith.constant dense<0.000000e+00> : vector<16x8xf32>
    %109 = tpu.matmul %33, %108, %cst_84 {dimension_numbers = #tpu.dot_dimension_numbers<[1], [0], [0], [1], [0, 0, 1, 1], [], []>} : vector<16x32xf32>, vector<32x8xf32>, vector<16x8xf32> -> vector<16x8xf32>
    %110 = vector.shape_cast %103 : vector<16x8xf32> to vector<1x16x8xf32>
    %111 = vector.shape_cast %106 : vector<16x8xf32> to vector<1x16x8xf32>
    %112 = vector.shape_cast %109 : vector<16x8xf32> to vector<1x16x8xf32>
    "tpu.trace_start"() <{level = 10 : i32, message = "bnd,bmd->bnm"}> : () -> ()
    %cst_85 = arith.constant dense<0.000000e+00> : vector<1x16x16xf32>
    %113 = tpu.matmul %110, %111, %cst_85 {dimension_numbers = #tpu.dot_dimension_numbers<[2], [2], [1], [1], [0, 0, 0, 1, 1, 1], [0], [0]>} : vector<1x16x8xf32>, vector<1x16x8xf32>, vector<1x16x16xf32> -> vector<1x16x16xf32>
    "tpu.trace_stop"() : () -> ()
    %c0_86 = arith.constant 0 : index
    %c2_87 = arith.constant 2 : index
    %c0_88 = arith.constant 0 : index
    %c0_89 = arith.constant 0 : index
    %114 = vector.load %arg10[%c0_86, %c2_87, %c0_88, %c0_89] : memref<1x4x16x16xf32, #tpu.memory_space<vmem>>, vector<1x1x16x16xf32>
    %115 = vector.shape_cast %114 : vector<1x1x16x16xf32> to vector<16x16xf32>
    %116 = vector.shape_cast %115 : vector<16x16xf32> to vector<1x16x16xf32>
    %117 = arith.addf %113, %116 : vector<1x16x16xf32>
    %cst_90 = arith.constant dense<0xFF800000> : vector<1x16xf32>
    %118 = vector.multi_reduction <maximumf>, %117, %cst_90 [2] : vector<1x16x16xf32> to vector<1x16xf32>
    %119 = vector.shape_cast %118 : vector<1x16xf32> to vector<1x16x1xf32>
    %120 = vector.broadcast %119 : vector<1x16x1xf32> to vector<1x16x16xf32>
    %121 = arith.subf %117, %120 : vector<1x16x16xf32>
    %122 = math.exp %121 : vector<1x16x16xf32>
    %cst_91 = arith.constant dense<0.000000e+00> : vector<1x16xf32>
    %123 = vector.multi_reduction <add>, %122, %cst_91 [2] : vector<1x16x16xf32> to vector<1x16xf32>
    %124 = vector.shape_cast %123 : vector<1x16xf32> to vector<1x16x1xf32>
    "tpu.trace_start"() <{level = 10 : i32, message = "bnm,bmd->bnd"}> : () -> ()
    %cst_92 = arith.constant dense<0.000000e+00> : vector<1x16x8xf32>
    %125 = tpu.matmul %122, %112, %cst_92 {dimension_numbers = #tpu.dot_dimension_numbers<[2], [1], [1], [2], [0, 0, 0, 1, 1, 2], [0], [0]>} : vector<1x16x16xf32>, vector<1x16x8xf32>, vector<1x16x8xf32> -> vector<1x16x8xf32>
    "tpu.trace_stop"() : () -> ()
    %126 = tpu.reciprocal %124 : vector<1x16x1xf32> -> vector<1x16x1xf32>
    %127 = vector.broadcast %126 : vector<1x16x1xf32> to vector<1x16x8xf32>
    %128 = arith.mulf %125, %127 : vector<1x16x8xf32>
    %129 = vector.shape_cast %128 : vector<1x16x8xf32> to vector<16x8xf32>
    %c0_93 = arith.constant 0 : index
    %c2_94 = arith.constant 2 : index
    %c0_95 = arith.constant 0 : index
    %c0_96 = arith.constant 0 : index
    %130 = vector.load %arg9[%c0_93, %c2_94, %c0_95, %c0_96] : memref<1x4x8x32xf32, #tpu.memory_space<vmem>>, vector<1x1x8x32xf32>
    %131 = vector.shape_cast %130 : vector<1x1x8x32xf32> to vector<8x32xf32>
    %cst_97 = arith.constant dense<0.000000e+00> : vector<16x32xf32>
    %132 = tpu.matmul %129, %131, %cst_97 {dimension_numbers = #tpu.dot_dimension_numbers<[1], [0], [0], [1], [0, 0, 1, 1], [], []>} : vector<16x8xf32>, vector<8x32xf32>, vector<16x32xf32> -> vector<16x32xf32>
    %133 = arith.addf %100, %132 : vector<16x32xf32>
    %c0_98 = arith.constant 0 : index
    %c3 = arith.constant 3 : index
    %c0_99 = arith.constant 0 : index
    %c0_100 = arith.constant 0 : index
    %134 = vector.load %arg6[%c0_98, %c3, %c0_99, %c0_100] : memref<1x4x32x8xf32, #tpu.memory_space<vmem>>, vector<1x1x32x8xf32>
    %135 = vector.shape_cast %134 : vector<1x1x32x8xf32> to vector<32x8xf32>
    %cst_101 = arith.constant dense<0.000000e+00> : vector<16x8xf32>
    %136 = tpu.matmul %33, %135, %cst_101 {dimension_numbers = #tpu.dot_dimension_numbers<[1], [0], [0], [1], [0, 0, 1, 1], [], []>} : vector<16x32xf32>, vector<32x8xf32>, vector<16x8xf32> -> vector<16x8xf32>
    %c0_102 = arith.constant 0 : index
    %c3_103 = arith.constant 3 : index
    %c0_104 = arith.constant 0 : index
    %c0_105 = arith.constant 0 : index
    %137 = vector.load %arg7[%c0_102, %c3_103, %c0_104, %c0_105] : memref<1x4x32x8xf32, #tpu.memory_space<vmem>>, vector<1x1x32x8xf32>
    %138 = vector.shape_cast %137 : vector<1x1x32x8xf32> to vector<32x8xf32>
    %cst_106 = arith.constant dense<0.000000e+00> : vector<16x8xf32>
    %139 = tpu.matmul %33, %138, %cst_106 {dimension_numbers = #tpu.dot_dimension_numbers<[1], [0], [0], [1], [0, 0, 1, 1], [], []>} : vector<16x32xf32>, vector<32x8xf32>, vector<16x8xf32> -> vector<16x8xf32>
    %c0_107 = arith.constant 0 : index
    %c3_108 = arith.constant 3 : index
    %c0_109 = arith.constant 0 : index
    %c0_110 = arith.constant 0 : index
    %140 = vector.load %arg8[%c0_107, %c3_108, %c0_109, %c0_110] : memref<1x4x32x8xf32, #tpu.memory_space<vmem>>, vector<1x1x32x8xf32>
    %141 = vector.shape_cast %140 : vector<1x1x32x8xf32> to vector<32x8xf32>
    %cst_111 = arith.constant dense<0.000000e+00> : vector<16x8xf32>
    %142 = tpu.matmul %33, %141, %cst_111 {dimension_numbers = #tpu.dot_dimension_numbers<[1], [0], [0], [1], [0, 0, 1, 1], [], []>} : vector<16x32xf32>, vector<32x8xf32>, vector<16x8xf32> -> vector<16x8xf32>
    %143 = vector.shape_cast %136 : vector<16x8xf32> to vector<1x16x8xf32>
    %144 = vector.shape_cast %139 : vector<16x8xf32> to vector<1x16x8xf32>
    %145 = vector.shape_cast %142 : vector<16x8xf32> to vector<1x16x8xf32>
    "tpu.trace_start"() <{level = 10 : i32, message = "bnd,bmd->bnm"}> : () -> ()
    %cst_112 = arith.constant dense<0.000000e+00> : vector<1x16x16xf32>
    %146 = tpu.matmul %143, %144, %cst_112 {dimension_numbers = #tpu.dot_dimension_numbers<[2], [2], [1], [1], [0, 0, 0, 1, 1, 1], [0], [0]>} : vector<1x16x8xf32>, vector<1x16x8xf32>, vector<1x16x16xf32> -> vector<1x16x16xf32>
    "tpu.trace_stop"() : () -> ()
    %c0_113 = arith.constant 0 : index
    %c3_114 = arith.constant 3 : index
    %c0_115 = arith.constant 0 : index
    %c0_116 = arith.constant 0 : index
    %147 = vector.load %arg10[%c0_113, %c3_114, %c0_115, %c0_116] : memref<1x4x16x16xf32, #tpu.memory_space<vmem>>, vector<1x1x16x16xf32>
    %148 = vector.shape_cast %147 : vector<1x1x16x16xf32> to vector<16x16xf32>
    %149 = vector.shape_cast %148 : vector<16x16xf32> to vector<1x16x16xf32>
    %150 = arith.addf %146, %149 : vector<1x16x16xf32>
    %cst_117 = arith.constant dense<0xFF800000> : vector<1x16xf32>
    %151 = vector.multi_reduction <maximumf>, %150, %cst_117 [2] : vector<1x16x16xf32> to vector<1x16xf32>
    %152 = vector.shape_cast %151 : vector<1x16xf32> to vector<1x16x1xf32>
    %153 = vector.broadcast %152 : vector<1x16x1xf32> to vector<1x16x16xf32>
    %154 = arith.subf %150, %153 : vector<1x16x16xf32>
    %155 = math.exp %154 : vector<1x16x16xf32>
    %cst_118 = arith.constant dense<0.000000e+00> : vector<1x16xf32>
    %156 = vector.multi_reduction <add>, %155, %cst_118 [2] : vector<1x16x16xf32> to vector<1x16xf32>
    %157 = vector.shape_cast %156 : vector<1x16xf32> to vector<1x16x1xf32>
    "tpu.trace_start"() <{level = 10 : i32, message = "bnm,bmd->bnd"}> : () -> ()
    %cst_119 = arith.constant dense<0.000000e+00> : vector<1x16x8xf32>
    %158 = tpu.matmul %155, %145, %cst_119 {dimension_numbers = #tpu.dot_dimension_numbers<[2], [1], [1], [2], [0, 0, 0, 1, 1, 2], [0], [0]>} : vector<1x16x16xf32>, vector<1x16x8xf32>, vector<1x16x8xf32> -> vector<1x16x8xf32>
    "tpu.trace_stop"() : () -> ()
    %159 = tpu.reciprocal %157 : vector<1x16x1xf32> -> vector<1x16x1xf32>
    %160 = vector.broadcast %159 : vector<1x16x1xf32> to vector<1x16x8xf32>
    %161 = arith.mulf %158, %160 : vector<1x16x8xf32>
    %162 = vector.shape_cast %161 : vector<1x16x8xf32> to vector<16x8xf32>
    %c0_120 = arith.constant 0 : index
    %c3_121 = arith.constant 3 : index
    %c0_122 = arith.constant 0 : index
    %c0_123 = arith.constant 0 : index
    %163 = vector.load %arg9[%c0_120, %c3_121, %c0_122, %c0_123] : memref<1x4x8x32xf32, #tpu.memory_space<vmem>>, vector<1x1x8x32xf32>
    %164 = vector.shape_cast %163 : vector<1x1x8x32xf32> to vector<8x32xf32>
    %cst_124 = arith.constant dense<0.000000e+00> : vector<16x32xf32>
    %165 = tpu.matmul %162, %164, %cst_124 {dimension_numbers = #tpu.dot_dimension_numbers<[1], [0], [0], [1], [0, 0, 1, 1], [], []>} : vector<16x8xf32>, vector<8x32xf32>, vector<16x32xf32> -> vector<16x32xf32>
    %166 = arith.addf %133, %165 : vector<16x32xf32>
    %c0_125 = arith.constant 0 : index
    %c0_126 = arith.constant 0 : index
    %c0_127 = arith.constant 0 : index
    %167 = vector.load %arg11[%c0_125, %c0_126, %c0_127] : memref<1x1x32xf32, #tpu.memory_space<vmem>>, vector<1x1x32xf32>
    %168 = vector.shape_cast %167 : vector<1x1x32xf32> to vector<1x32xf32>
    %169 = vector.broadcast %168 : vector<1x32xf32> to vector<16x32xf32>
    %170 = arith.addf %166, %169 : vector<16x32xf32>
    %171 = arith.addf %170, %3 : vector<16x32xf32>
    %c0_128 = arith.constant 0 : index
    %c0_129 = arith.constant 0 : index
    %c0_130 = arith.constant 0 : index
    %172 = vector.load %arg12[%c0_128, %c0_129, %c0_130] : memref<1x1x32xf32, #tpu.memory_space<vmem>>, vector<1x1x32xf32>
    %173 = vector.shape_cast %172 : vector<1x1x32xf32> to vector<1x32xf32>
    %c0_131 = arith.constant 0 : index
    %c0_132 = arith.constant 0 : index
    %c0_133 = arith.constant 0 : index
    %174 = vector.load %arg13[%c0_131, %c0_132, %c0_133] : memref<1x1x32xf32, #tpu.memory_space<vmem>>, vector<1x1x32xf32>
    %175 = vector.shape_cast %174 : vector<1x1x32xf32> to vector<1x32xf32>
    %cst_134 = arith.constant dense<0.000000e+00> : vector<16xf32>
    %176 = vector.multi_reduction <add>, %171, %cst_134 [1] : vector<16x32xf32> to vector<16xf32>
    %177 = vector.shape_cast %176 : vector<16xf32> to vector<16x1xf32>
    %cst_135 = arith.constant 3.200000e+01 : f32
    %178 = vector.broadcast %cst_135 : f32 to vector<16x1xf32>
    %179 = arith.divf %177, %178 : vector<16x1xf32>
    %180 = vector.broadcast %179 : vector<16x1xf32> to vector<16x32xf32>
    %181 = arith.subf %171, %180 : vector<16x32xf32>
    %182 = arith.mulf %181, %181 : vector<16x32xf32>
    %cst_136 = arith.constant dense<0.000000e+00> : vector<16xf32>
    %183 = vector.multi_reduction <add>, %182, %cst_136 [1] : vector<16x32xf32> to vector<16xf32>
    %184 = vector.shape_cast %183 : vector<16xf32> to vector<16x1xf32>
    %cst_137 = arith.constant 3.200000e+01 : f32
    %185 = vector.broadcast %cst_137 : f32 to vector<16x1xf32>
    %186 = arith.divf %184, %185 : vector<16x1xf32>
    %187 = vector.broadcast %179 : vector<16x1xf32> to vector<16x32xf32>
    %188 = arith.subf %171, %187 : vector<16x32xf32>
    %cst_138 = arith.constant 9.99999974E-6 : f32
    %189 = vector.broadcast %cst_138 : f32 to vector<16x1xf32>
    %190 = arith.addf %186, %189 : vector<16x1xf32>
    %191 = math.rsqrt %190 : vector<16x1xf32>
    %192 = vector.broadcast %191 : vector<16x1xf32> to vector<16x32xf32>
    %193 = arith.mulf %188, %192 : vector<16x32xf32>
    %194 = vector.broadcast %173 : vector<1x32xf32> to vector<16x32xf32>
    %195 = arith.mulf %193, %194 : vector<16x32xf32>
    %196 = vector.broadcast %175 : vector<1x32xf32> to vector<16x32xf32>
    %197 = arith.addf %195, %196 : vector<16x32xf32>
    %c0_139 = arith.constant 0 : index
    %c0_140 = arith.constant 0 : index
    %c0_141 = arith.constant 0 : index
    %198 = vector.load %arg14[%c0_139, %c0_140, %c0_141] : memref<1x32x128xf32, #tpu.memory_space<vmem>>, vector<1x32x128xf32>
    %199 = vector.shape_cast %198 : vector<1x32x128xf32> to vector<32x128xf32>
    %cst_142 = arith.constant dense<0.000000e+00> : vector<16x128xf32>
    %200 = tpu.matmul %197, %199, %cst_142 {dimension_numbers = #tpu.dot_dimension_numbers<[1], [0], [0], [1], [0, 0, 1, 1], [], []>} : vector<16x32xf32>, vector<32x128xf32>, vector<16x128xf32> -> vector<16x128xf32>
    %c0_143 = arith.constant 0 : index
    %c0_144 = arith.constant 0 : index
    %c0_145 = arith.constant 0 : index
    %201 = vector.load %arg15[%c0_143, %c0_144, %c0_145] : memref<1x1x128xf32, #tpu.memory_space<vmem>>, vector<1x1x128xf32>
    %202 = vector.shape_cast %201 : vector<1x1x128xf32> to vector<1x128xf32>
    %203 = vector.broadcast %202 : vector<1x128xf32> to vector<16x128xf32>
    %204 = arith.addf %200, %203 : vector<16x128xf32>
    %cst_146 = arith.constant 5.000000e-01 : f32
    %205 = vector.broadcast %cst_146 : f32 to vector<16x128xf32>
    %206 = arith.mulf %204, %205 : vector<16x128xf32>
    %cst_147 = arith.constant 1.41421354 : f32
    %207 = vector.broadcast %cst_147 : f32 to vector<16x128xf32>
    %208 = arith.divf %204, %207 : vector<16x128xf32>
    %209 = math.erf %208 : vector<16x128xf32>
    %cst_148 = arith.constant 1.000000e+00 : f32
    %210 = vector.broadcast %cst_148 : f32 to vector<16x128xf32>
    %211 = arith.addf %210, %209 : vector<16x128xf32>
    %212 = arith.mulf %206, %211 : vector<16x128xf32>
    %c0_149 = arith.constant 0 : index
    %c0_150 = arith.constant 0 : index
    %c0_151 = arith.constant 0 : index
    %213 = vector.load %arg16[%c0_149, %c0_150, %c0_151] : memref<1x128x32xf32, #tpu.memory_space<vmem>>, vector<1x128x32xf32>
    %214 = vector.shape_cast %213 : vector<1x128x32xf32> to vector<128x32xf32>
    %cst_152 = arith.constant dense<0.000000e+00> : vector<16x32xf32>
    %215 = tpu.matmul %212, %214, %cst_152 {dimension_numbers = #tpu.dot_dimension_numbers<[1], [0], [0], [1], [0, 0, 1, 1], [], []>} : vector<16x128xf32>, vector<128x32xf32>, vector<16x32xf32> -> vector<16x32xf32>
    %c0_153 = arith.constant 0 : index
    %c0_154 = arith.constant 0 : index
    %c0_155 = arith.constant 0 : index
    %216 = vector.load %arg17[%c0_153, %c0_154, %c0_155] : memref<1x1x32xf32, #tpu.memory_space<vmem>>, vector<1x1x32xf32>
    %217 = vector.shape_cast %216 : vector<1x1x32xf32> to vector<1x32xf32>
    %218 = vector.broadcast %217 : vector<1x32xf32> to vector<16x32xf32>
    %219 = arith.addf %215, %218 : vector<16x32xf32>
    %cst_156 = arith.constant 2.000000e+00 : f32
    %220 = vector.broadcast %cst_156 : f32 to vector<16x32xf32>
    %221 = arith.mulf %220, %219 : vector<16x32xf32>
    %c0_157 = arith.constant 0 : index
    %c0_158 = arith.constant 0 : index
    %222 = vector.load %arg19[%c0_157, %c0_158] : memref<16x32xf32, #tpu.memory_space<vmem>>, vector<16x32xf32>
    tpu.vector_store %arg19[%c0_157, %c0_158], %221 {strides = array<i32>} : memref<16x32xf32, #tpu.memory_space<vmem>>, vector<16x32xf32>,
    %c1_i32 = arith.constant 1 : i32
    %223 = arith.cmpi eq, %arg1, %c1_i32 : i32
    %224 = arith.extui %223 : i1 to i32
    %c0_i32_159 = arith.constant 0 : i32
    %225 = arith.cmpi ne, %224, %c0_i32_159 : i32
    scf.if %225 {
      %c0_160 = arith.constant 0 : index
      %c0_161 = arith.constant 0 : index
      %226 = vector.load %arg18[%c0_160, %c0_161] : memref<16x32xf32, #tpu.memory_space<vmem>>, vector<16x32xf32>
      tpu.vector_store %arg18[%c0_160, %c0_161], %221 {strides = array<i32>} : memref<16x32xf32, #tpu.memory_space<vmem>>, vector<16x32xf32>,
    } else {
    }
    return
  }
  func.func @transform_0(%arg0: i32, %arg1: i32) -> (i32, i32) {
    %c0_i32 = arith.constant 0 : i32
    %c0_i32_0 = arith.constant 0 : i32
    return %arg0, %c0_i32 : i32, i32
  }
  func.func @transform_1(%arg0: i32, %arg1: i32) -> (i32, i32, i32) {
    %c0_i32 = arith.constant 0 : i32
    %c0_i32_0 = arith.constant 0 : i32
    return %arg1, %arg0, %c0_i32 : i32, i32, i32
  }
  func.func @transform_2(%arg0: i32, %arg1: i32) -> (i32, i32, i32) {
    %c0_i32 = arith.constant 0 : i32
    %c0_i32_0 = arith.constant 0 : i32
    %c0_i32_1 = arith.constant 0 : i32
    return %arg1, %c0_i32, %c0_i32_0 : i32, i32, i32
  }
  func.func @transform_3(%arg0: i32, %arg1: i32) -> (i32, i32, i32) {
    %c0_i32 = arith.constant 0 : i32
    %c0_i32_0 = arith.constant 0 : i32
    %c0_i32_1 = arith.constant 0 : i32
    return %arg1, %c0_i32, %c0_i32_0 : i32, i32, i32
  }
  func.func @transform_4(%arg0: i32, %arg1: i32) -> (i32, i32, i32, i32) {
    %c0_i32 = arith.constant 0 : i32
    %c0_i32_0 = arith.constant 0 : i32
    %c0_i32_1 = arith.constant 0 : i32
    %c0_i32_2 = arith.constant 0 : i32
    return %arg1, %c0_i32, %c0_i32_0, %c0_i32_1 : i32, i32, i32, i32
  }
  func.func @transform_5(%arg0: i32, %arg1: i32) -> (i32, i32, i32, i32) {
    %c0_i32 = arith.constant 0 : i32
    %c0_i32_0 = arith.constant 0 : i32
    %c0_i32_1 = arith.constant 0 : i32
    %c0_i32_2 = arith.constant 0 : i32
    return %arg1, %c0_i32, %c0_i32_0, %c0_i32_1 : i32, i32, i32, i32
  }
  func.func @transform_6(%arg0: i32, %arg1: i32) -> (i32, i32, i32, i32) {
    %c0_i32 = arith.constant 0 : i32
    %c0_i32_0 = arith.constant 0 : i32
    %c0_i32_1 = arith.constant 0 : i32
    %c0_i32_2 = arith.constant 0 : i32
    return %arg1, %c0_i32, %c0_i32_0, %c0_i32_1 : i32, i32, i32, i32
  }
  func.func @transform_7(%arg0: i32, %arg1: i32) -> (i32, i32, i32, i32) {
    %c0_i32 = arith.constant 0 : i32
    %c0_i32_0 = arith.constant 0 : i32
    %c0_i32_1 = arith.constant 0 : i32
    %c0_i32_2 = arith.constant 0 : i32
    return %arg1, %c0_i32, %c0_i32_0, %c0_i32_1 : i32, i32, i32, i32
  }
  func.func @transform_8(%arg0: i32, %arg1: i32) -> (i32, i32, i32, i32) {
    %c0_i32 = arith.constant 0 : i32
    %c0_i32_0 = arith.constant 0 : i32
    %c0_i32_1 = arith.constant 0 : i32
    %c0_i32_2 = arith.constant 0 : i32
    return %arg1, %c0_i32, %c0_i32_0, %c0_i32_1 : i32, i32, i32, i32
  }
  func.func @transform_9(%arg0: i32, %arg1: i32) -> (i32, i32, i32) {
    %c0_i32 = arith.constant 0 : i32
    %c0_i32_0 = arith.constant 0 : i32
    %c0_i32_1 = arith.constant 0 : i32
    return %arg1, %c0_i32, %c0_i32_0 : i32, i32, i32
  }
  func.func @transform_10(%arg0: i32, %arg1: i32) -> (i32, i32, i32) {
    %c0_i32 = arith.constant 0 : i32
    %c0_i32_0 = arith.constant 0 : i32
    %c0_i32_1 = arith.constant 0 : i32
    return %arg1, %c0_i32, %c0_i32_0 : i32, i32, i32
  }
  func.func @transform_11(%arg0: i32, %arg1: i32) -> (i32, i32, i32) {
    %c0_i32 = arith.constant 0 : i32
    %c0_i32_0 = arith.constant 0 : i32
    %c0_i32_1 = arith.constant 0 : i32
    return %arg1, %c0_i32, %c0_i32_0 : i32, i32, i32
  }
  func.func @transform_12(%arg0: i32, %arg1: i32) -> (i32, i32, i32) {
    %c0_i32 = arith.constant 0 : i32
    %c0_i32_0 = arith.constant 0 : i32
    %c0_i32_1 = arith.constant 0 : i32
    return %arg1, %c0_i32, %c0_i32_0 : i32, i32, i32
  }
  func.func @transform_13(%arg0: i32, %arg1: i32) -> (i32, i32, i32) {
    %c0_i32 = arith.constant 0 : i32
    %c0_i32_0 = arith.constant 0 : i32
    %c0_i32_1 = arith.constant 0 : i32
    return %arg1, %c0_i32, %c0_i32_0 : i32, i32, i32
  }
  func.func @transform_14(%arg0: i32, %arg1: i32) -> (i32, i32, i32) {
    %c0_i32 = arith.constant 0 : i32
    %c0_i32_0 = arith.constant 0 : i32
    %c0_i32_1 = arith.constant 0 : i32
    return %arg1, %c0_i32, %c0_i32_0 : i32, i32, i32
  }
  func.func @transform_15(%arg0: i32, %arg1: i32) -> (i32, i32, i32) {
    %c0_i32 = arith.constant 0 : i32
    %c0_i32_0 = arith.constant 0 : i32
    %c0_i32_1 = arith.constant 0 : i32
    return %arg1, %c0_i32, %c0_i32_0 : i32, i32, i32
  }
  func.func @transform_16(%arg0: i32, %arg1: i32) -> (i32, i32) {
    %c0_i32 = arith.constant 0 : i32
    %c0_i32_0 = arith.constant 0 : i32
    return %arg0, %c0_i32 : i32, i32
  }
}

</mosaic_0001>

<bundles_post_ra>
// kernel: tpu_custom_call.1
= control target key start
LH: loop header
LB: loop body
LE: loop exit
PB: predicated region body
PF: predicated region fallthrough
CT: control target
= control target key end

     0   :  { %s4986_s0 = inlined_call_operand.vmem [shape: f32[32,32], index: 0, kind: input, shape index: {}]   ;;  %s4987_s1 = inlined_call_operand.vmem [shape: f32[2,32,1], index: 1, kind: input, shape index: {}]   ;;  %s4988_s2 = inlined_call_operand.vmem [shape: f32[2,1,32], index: 2, kind: input, shape index: {}]   ;;  %s4989_s3 = inlined_call_operand.vmem [shape: f32[2,1,32], index: 3, kind: input, shape index: {}]   ;;  %s4990_s4 = inlined_call_operand.vmem [shape: f32[2,4,32,8], index: 4, kind: input, shape index: {}]   ;;  %s4991_s5 = inlined_call_operand.vmem [shape: f32[2,4,32,8], index: 5, kind: input, shape index: {}]   ;;  %s4992_s6 = inlined_call_operand.vmem [shape: f32[2,4,32,8], index: 6, kind: input, shape index: {}]   ;;  %s4993_s7 = inlined_call_operand.vmem [shape: f32[2,4,8,32], index: 7, kind: input, shape index: {}]   ;;  %s4994_s8 = inlined_call_operand.vmem [shape: f32[2,4,16,16], index: 8, kind: input, shape index: {}]   ;;  %s4995_s9 = inlined_call_operand.vmem [shape: f32[2,1,32], index: 9, kind: input, shape index: {}]   ;;  %s4996_s10 = inlined_call_operand.vmem [shape: f32[2,1,32], index: 10, kind: input, shape index: {}]   ;;  %s4997_s11 = inlined_call_operand.vmem [shape: f32[2,1,32], index: 11, kind: input, shape index: {}]   ;;  %s4998_s12 = inlined_call_operand.vmem [shape: f32[2,32,128], index: 12, kind: input, shape index: {}]   ;;  %s4999_s13 = inlined_call_operand.vmem [shape: f32[2,1,128], index: 13, kind: input, shape index: {}]   ;;  %s5000_s14 = inlined_call_operand.vmem [shape: f32[2,128,32], index: 14, kind: input, shape index: {}]   ;;  %s5001_s15 = inlined_call_operand.vmem [shape: f32[2,1,32], index: 15, kind: input, shape index: {}]   ;;  %s5002_s16 = inlined_call_operand.hbm [shape: f32[32,32], index: 16, kind: output, shape index: {}]  }
   0x1   :  { %5021 = sst [smem:[#allocation22_spill]] %s4986_s0 }
   0x2   :  { %5022 = sst [smem:[#allocation23_spill]] %s4987_s1 }
   0x3   :  { %5023 = sst [smem:[#allocation24_spill]] %s4990_s4 }
   0x4   :  { %5024 = sst [smem:[#allocation25_spill]] %s4991_s5 }
   0x5   :  { %5025 = sst [smem:[#allocation26_spill]] %s4992_s6 }
   0x6   :  { %5026 = sst [smem:[#allocation27_spill]] %s4993_s7 }
   0x7   :  { %5027 = sst [smem:[#allocation28_spill]] %s4994_s8 }
   0x8   :  { %5028 = sst [smem:[#allocation29_spill]] %s4996_s10 }
   0x9   :  { %5029 = sst [smem:[#allocation30_spill]] %s4999_s13 }
   0xa   :  { %5030 = sst [smem:[#allocation31_spill]] %s5000_s14 }
   0xb   :  { %5031 = sst [smem:[#allocation32_spill]] %s5001_s15 }
   0xc   :  { %5032 = sst [smem:[#allocation33_spill]] %s5002_s16 }
   0xd   :  { %21 = vsyncpa [#allocation4], 0 }
   0xe   :  { %23 = vsyncpa [#allocation4 + $0x1], 0  ;;  %s4500_s21 = smov 0   ;;  %s4502_s22 = smov 0  }
   0xf   :  { %s4504_s23 = smov 0   ;;  %s4506_s24 = smov 0  }
  0x10   :  { %s4508_s25 = smov 0   ;;  %s4510_s26 = smov 0  }
  0x11   :  { %s4512_s27 = smov 0   ;;  %s4514_s28 = smov 0  }
  0x12 LB: > { %5033 = sst [smem:[#allocation6_spill]] %s4381_s21  ;;  %s3469_s29 = sadd.s32 4294967295, %s4409_s28   ;;  %s4409_s28 = sphi %s4514_s28, %s29_s28   ;;  %s4405_s27 = sphi %s4512_s27, %s5090_s27   ;;  %s4401_s26 = sphi %s4510_s26, %s5089_s26   ;;  %s4397_s25 = sphi %s4508_s25, %s5088_s25   ;;  %s4393_s24 = sphi %s4506_s24, %s5087_s24   ;;  %s4389_s23 = sphi %s4504_s23, %s5086_s23   ;;  %s4385_s22 = sphi %s4502_s22, %s5085_s22   ;;  %s4381_s21 = sphi %s4500_s21, %s5084_s21  }
  0x13   : > { %5034 = sst [smem:[#allocation7_spill]] %s4385_s22  ;;  %s3470_s30 = sadd.s32 4294967294, %s4409_s28  }
  0x14   : > { %5035 = sst [smem:[#allocation8_spill]] %s4389_s23  ;;  %s38_s0 = sadd.s32 1, %s4401_s26 }
  0x15   : > { %5036 = sst [smem:[#allocation9_spill]] %s4393_s24  ;;  %p39_p0 = scmp.ge.s32.totalorder %s38_s0, 2 }
  0x16   : > { %5037 = sst [smem:[#allocation10_spill]] %s4397_s25  ;;  %s41_s17 = sadd.s32 1, %s4405_s27 }
  0x17   : > { %5038 = sst [smem:[#allocation11_spill]] %s4401_s26  ;;  %p476_p1 = scmp.ne.s32.totalorder %s4389_s23, %s4385_s22 }
  0x18   : > { %5039 = sst [smem:[#allocation12_spill]] %s4405_s27  ;;  %p477_p2 = scmp.eq.s32.totalorder %s3469_s29, 3 }
  0x19   : > { %5040 = sst [smem:[#allocation13_spill]] %s4409_s28  ;;  %s5092_s0 = smov (%p39_p0, %s38_s0), 0 }
  0x1a   : > { %5041 = sst [smem:[#allocation14_spill]] %s5092_s0  ;;  %s5094_s17 = smov (!%p39_p0, %s41_s17), %s4405_s27 }
  0x1b   : > { %p4549_p3 = por %p477_p2, %p476_p1  ;;  %p482_p4 = scmp.ne.s32.totalorder %s4385_s22, %s4381_s21 }
  0x1c   : > { %p43_p5 = scmp.ge.s32.totalorder %s5094_s17, 2  ;;  %p483_p6 = scmp.eq.s32.totalorder %s3470_s30, 3 }
  0x1d   : > { %s5042_s18 = scalar_select %p4549_p3, 1, 0 }
  0x1e   : > { %p3473_p7 = scmp.ge.s32.totalorder %s4409_s28, 1  ;;  %p621_p8 = scmp.lt.s32.totalorder %s4409_s28, 5 }
  0x1f   : > { %5043 = sst [smem:[#allocation15_spill]] %s5042_s18  ;;  %s5096_s17 = smov (%p43_p5, %s5094_s17), 0 }
  0x20   : > { %5044 = sst [smem:[#allocation16_spill]] %s5096_s17  ;;  %p4559_p9 = por %p483_p6, %p482_p4 }
  0x21   : > { %p622_p10 = pnand %p3473_p7, %p621_p8  ;;  %s463_s20 = ssub.s32 %s4405_s27, %s5096_s17 }
  0x22   : > { %s5045_s19 = scalar_select %p4559_p9, 1, 0 }
  0x23   : > { %s466_s29 = sadd.s32 1, %s4389_s23  ;;  %p464_p11 = scmp.eq.s32.totalorder %s463_s20, 0 }
  0x24   : > { %5046 = sst [smem:[#allocation17_spill]] %s5045_s19  ;;  %625 = sbr.rel (%p622_p10) target bundleno = 4483 (0x1183), region = 84 }
  0x25   : > { %s4567_s0 = scalar_select %p464_p11, %s4389_s23, %s466_s29  }
  0x27   : > { %5047 = sst [smem:[#allocation18_spill]] %s4567_s0 }
  0x2b   : > { %s5009_s30 = sand.u32 1, %s4385_s22   ;;  %s3475_s26 = sshll.u32 %s4397_s25, 1 }
  0x2c   : > { %s3474_s21 = sshll.u32 %s5009_s30, 4  ;;  %p737_p12 = scmp.lt.s32.totalorder %s3475_s26, 3 }
  0x2d   : > { %p743_p13 = scmp.lt.s32.totalorder %s4393_s24, 1  ;;  %s5048_s27 = sld [smem:[#allocation22_spill]] }
  0x2e   : > { %s5098_s26 = smov (!%p737_p12, %s3475_s26), 3  ;;  %s5049_s1 = sld [smem:[#allocation23_spill]] }
  0x2f   : > { %s4575_s19 = scalar_select %p743_p13, %s4393_s24, 1 }
  0x30   : > { %s3476_s20 = sshll.u32 %s5098_s26, 3  ;;  %s5050_s4 = sld [smem:[#allocation24_spill]] }
  0x31   : > { %s3478_s23 = sshll.u32 %s4575_s19, 2  ;;  %s5051_s5 = sld [smem:[#allocation25_spill]] }
  0x32   : > { %s748_s30 = sadd.s32 %s3478_s23, %s5098_s26  ;;  %s5052_s6 = sld [smem:[#allocation26_spill]] }
  0x33   : > { %s740_s0 = scalar_lea.vmem %s5048_s27, %s3476_s20  ;;  %s3479_s22 = sshll.u32 %s748_s30, 3 }
  0x34   : > { %s4592_s17 = scalar_lea.vmem %s5049_s1, %s3479_s22  ;;  %s3611_s27 = sshll.u32 %s4575_s19, 7 }
  0x35   : > { %s3614_s13 = sshll.u32 %s4575_s19, 5  ;;  %s5054_s7 = sld [smem:[#allocation27_spill]] }
  0x36   : > { %s4598_s23 = scalar_lea.vmem %s5050_s4, %s3611_s27  ;;  %s3615_s18 = sshll.u32 %s4575_s19, 6 }
  0x37   : > { %s4603_s28 = scalar_lea.vmem %s5051_s5, %s3611_s27  ;;  %s5056_s8 = sld [smem:[#allocation28_spill]] }
  0x38   : > { %s4608_s25 = scalar_lea.vmem %s5052_s6, %s3611_s27  ;;  %s791_s14 = scalar_lea.vmem %s4997_s11, %s4575_s19 }
  0x39   : > { %5053 = sst [smem:[#allocation19_spill]] %s4608_s25  ;;  %s5059_s29 = sld [smem:[#allocation30_spill]] }
  0x3a   : > { %s5060_s26 = sld [smem:[#allocation31_spill]]  ;;  %s5061_s24 = sld [smem:[#allocation32_spill]] }
  0x3b   : > { %s4614_s15 = scalar_lea.vmem %s5054_s7, %s3614_s13  ;;  %s4652_s6 = scalar_lea.vmem [#allocation3], %s3474_s21 }
  0x3c   : > { %5055 = sst [smem:[#allocation20_spill]] %s4614_s15  ;;  %s4637_s15 = scalar_lea.vmem %s4998_s12, %s3614_s13 }
  0x3d   : > { %s4620_s1 = scalar_lea.vmem %s5056_s8, %s3615_s18  ;;  %s5062_s25 = sld [smem:[#allocation9_spill]] }
  0x3e   : > { %5057 = sst [smem:[#allocation21_spill]] %s4620_s1 }
  0x3f   : > { %s799_s8 = scalar_lea.vmem %s5059_s29, %s4575_s19 }
  0x40   : > { %s4646_s4 = scalar_lea.vmem %s5060_s26, %s3611_s27  ;;  %s807_s10 = scalar_lea.vmem %s5061_s24, %s4575_s19 }
  0x43   : > { %p3494_p0 = scmp.ne.s32.totalorder %s5062_s25, 0 }
  0x44   : > { %v813_v0 = vld [vmem:[%s740_s0] sm:$0xff] (!%p3494_p0)  ;;  %vm815_vm0 = vcmask (!%p3494_p0), 261120   ;;  %v814_v1 = vld [vmem:[%s740_s0 + $0x8] sm:$0xff] (!%p3494_p0) }
  0x45   : > { %812 = sbr.rel (%p3494_p0) target bundleno = 76 (0x4c), region = 88  ;;  %816 = vst.msk [vmem:[#allocation2] sm:$0xff] (!%p3494_p0), %vm815_vm0, %v813_v0  ;;  %817 = vst.msk [vmem:[#allocation2 + $0x8] sm:$0xff] (!%p3494_p0), %vm815_vm0, %v814_v1 }
  0x4c PF: > { %v4655_v2 = vld [vmem:[#allocation2] sm:$0xff]  ;;  %vm822_vm1 = vcmask 261120   ;;  %v4657_v3 = vld [vmem:[#allocation2 + $0x8] sm:$0xff]  ;;  %v4411_v7 = vmov 0   ;;  %v882_v22 = vld [vmem:[%s4598_s23 + $0x10] sm:$0xff]  ;;  %s5063_s21 = scalar_lea.vmem %s4988_s2, %s4575_s19  ;;  %s5064_s27 = scalar_lea.vmem %s4989_s3, %s4575_s19  ;;  %vm1125_vm2 = vcmask 64512  }
  0x4d   : > { %v823_v4 = vsel %vm822_vm1, %v4655_v2, 0.0  ;;  %v826_v5 = vsel %vm822_vm1, %v4657_v3, 0.0  ;;  %v866_v6 = vld [vmem:[%s4592_s17] sm:$0xff]  ;;  %4269 = vset.pattern.permute.xlu0 %v4411_v7  ;;  %4270 = vset.pattern.permute.xlu1 %v4411_v7  ;;  %v867_v18 = vld [vmem:[%s4592_s17 + $0x8] sm:$0xff]  ;;  %v883_v23 = vld [vmem:[%s4598_s23 + $0x18] sm:$0xff]  ;;  %s5065_s13 = sld [smem:[#allocation19_spill]]  ;;  %s5070_s20 = scalar_lea.vmem %s4995_s9, %s4575_s19 }
  0x4e   : > { %824 = vadd.xlane.f32.xlu0 %v823_v4  ;;  %v880_v19 = vld [vmem:[%s4598_s23] sm:$0xff]  ;;  %v881_v20 = vld [vmem:[%s4598_s23 + $0x8] sm:$0xff]  ;;  %v4017_v24 = vpack.c.bf16 %v883_v23, %v882_v22  ;;  %v967_v46 = vld [vmem:[%s4603_s28 + $0x10] sm:$0xff]  ;;  %s5068_s24 = sld [smem:[#allocation21_spill]]  ;;  %vm1213_vm4 = vcmask 130048   ;;  %s5069_s22 = sld [smem:[#allocation20_spill]] }
  0x4f   : > { %v4013_v21 = vpack.c.bf16 %v881_v20, %v880_v19  ;;  %v965_v25 = vld [vmem:[%s4603_s28] sm:$0xff]  ;;  %v966_v26 = vld [vmem:[%s4603_s28 + $0x8] sm:$0xff]  ;;  %v968_v47 = vld [vmem:[%s4603_s28 + $0x18] sm:$0xff]  ;;  %s5071_s29 = sld [smem:[#allocation29_spill]]  ;;  %s5075_s7 = sld [smem:[#allocation9_spill]] }
  0x50   : > { %v4021_v27 = vpack.c.bf16 %v966_v26, %v965_v25  ;;  %v3495_v35 = vld [vmem:[%s5063_s21] ss:$0 sm:$0xff]  ;;  %v4025_v50 = vpack.c.bf16 %v968_v47, %v967_v46  ;;  %v3510_v60 = vld [vmem:[%s4598_s23 + $0x28] sm:$0xff]  ;;  %vm4712_vm3 = vmpackc.low %vm1125_vm2, %vm1125_vm2 }
  0x51   : > { %4014 = vmatprep.subr.bf16.mxu1 %v4013_v21  ;;  %v3496_v37 = vld [vmem:[%s5064_s27] ss:$0 sm:$0xff]  ;;  %v3511_v4 = vld [vmem:[%s4598_s23 + $0x30] sm:$0xff] }
  0x52   : > { %827 = vadd.xlane.f32.xlu0 %v826_v5  ;;  %4016 = vmatpush3.bf16.msra.mxu1 %v4013_v21  ;;  %v3509_v59 = vld [vmem:[%s4598_s23 + $0x20] sm:$0xff]  ;;  %v3512_v5 = vld [vmem:[%s4598_s23 + $0x38] sm:$0xff] }
  0x53   : > { %4018 = vmatprep.subr.bf16.mxu1 %v4017_v24  ;;  %v1044_v51 = vld [vmem:[%s5065_s13] sm:$0xff]  ;;  %v1045_v52 = vld [vmem:[%s5065_s13 + $0x8] sm:$0xff]  ;;  %v1046_v54 = vld [vmem:[%s5065_s13 + $0x10] sm:$0xff]  ;;  %v4047_v1 = vpack.c.bf16 %v3510_v60, %v3509_v59 }
  0x54   : > { %v4029_v53 = vpack.c.bf16 %v1045_v52, %v1044_v51  ;;  %v1047_v55 = vld [vmem:[%s5065_s13 + $0x18] sm:$0xff]  ;;  %v3541_v59 = vld [vmem:[%s4598_s23 + $0x48] sm:$0xff] }
  0x55   : > { %v4033_v56 = vpack.c.bf16 %v1047_v55, %v1046_v54  ;;  %v3528_v52 = vld [vmem:[%s5068_s24 + $0x18] sm:$0xff]  ;;  %s5072_s16 = scalar_lea.vmem %s5071_s29, %s4575_s19  ;;  %p3605_p1 = scmp.ne.s32.totalorder %s5075_s7, 1 }
  0x56   : > { %4020 = vmatpush3.bf16.msra.mxu1 %v4017_v24 }
  0x57   : > { %4022 = vmatprep.subr.bf16.mxu1 %v4021_v27 }
  0x68   : > { %870 = vperm.xlu0 %4269, %v866_v6  }
  0xdb   : > { %v825_v8 = vpop.xlane.xlu0 %824 }
  0xdc   : > { %v830_v9 = vmul.f32 0.03125, %v825_v8 }
  0xde   : > { %v832_v10 = vsub.f32 %v4655_v2, %v830_v9  ;;  %v4051_v9 = vpack.c.bf16 %v3512_v5, %v3511_v4 }
  0xdf   : > { %v828_v11 = vpop.xlane.xlu0 %827 }
  0xe0   : > { %v831_v12 = vmul.f32 0.03125, %v828_v11  ;;  %v834_v13 = vmul.f32 %v832_v10, %v832_v10  ;;  %v3522_v11 = vld [vmem:[%s5065_s13 + $0x28] sm:$0xff] }
  0xe2   : > { %v833_v14 = vsub.f32 %v4657_v3, %v831_v12  ;;  %v836_v15 = vsel %vm822_vm1, %v834_v13, 0.0  ;;  %v3523_v13 = vld [vmem:[%s5065_s13 + $0x30] sm:$0xff] }
  0xe3   : > { %837 = vadd.xlane.f32.xlu1 %v836_v15 }
  0xe4   : > { %v835_v16 = vmul.f32 %v833_v14, %v833_v14 }
  0xe6   : > { %v839_v17 = vsel %vm822_vm1, %v835_v16, 0.0  ;;  %v1124_v16 = vld [vmem:[%s5068_s24 + $0x8] sm:$0xff] }
  0xe7   : > { %840 = vadd.xlane.f32.xlu1 %v839_v17  ;;  %v871_v40 = vpop.permute.xlu0 %870  ;;  %v1123_v17 = vld [vmem:[%s5068_s24] sm:$0xff] }
  0xf8   : > { %875 = vperm.xlu1 %4270, %v867_v18  }
 0x170   : > { %v838_v28 = vpop.xlane.xlu1 %837 }
 0x171   : > { %v842_v29 = vmul.f32 0.03125, %v838_v28 }
 0x173   : > { %v844_v30 = vadd.f32 1e-05, %v842_v29  ;;  %v3515_v29 = vld [vmem:[%s4603_s28 + $0x20] sm:$0xff] }
 0x174   : > { %v841_v31 = vpop.xlane.xlu1 %840 }
 0x175   : > { %4271 = vrsqrt.f32 %v844_v30  ;;  %v843_v32 = vmul.f32 0.03125, %v841_v31  ;;  %v3516_v30 = vld [vmem:[%s4603_s28 + $0x28] sm:$0xff] }
 0x176   : > { %v4055_v31 = vpack.c.bf16 %v3516_v30, %v3515_v29  ;;  %v3546_v29 = vld [vmem:[%s4603_s28 + $0x40] sm:$0xff]  ;;  %v3547_v30 = vld [vmem:[%s4603_s28 + $0x48] sm:$0xff] }
 0x177   : > { %v845_v33 = vadd.f32 1e-05, %v843_v32 }
 0x178   : > { %v876_v45 = vpop.permute.xlu1 %875 }
 0x179   : > { %4273 = vrsqrt.f32 %v845_v33 }
 0x17f   : > { %v4272_v34 = vpop.eup %4271 }
 0x180   : > { %v848_v36 = vmul.f32 %v4272_v34, %v832_v10  ;;  %v3521_v10 = vld [vmem:[%s5065_s13 + $0x20] sm:$0xff] }
 0x181   : > { %v4063_v12 = vpack.c.bf16 %v3522_v11, %v3521_v10 }
 0x182   : > { %v856_v38 = vmul.f32 %v3495_v35, %v848_v36 }
 0x183   : > { %v4274_v39 = vpop.eup %4273 }
 0x184   : > { %v864_v41 = vadd.f32 %v3496_v37, %v856_v38  ;;  %v849_v42 = vmul.f32 %v4274_v39, %v833_v14  ;;  %v3524_v14 = vld [vmem:[%s5065_s13 + $0x38] sm:$0xff]  ;;  %v3517_v38 = vld [vmem:[%s4603_s28 + $0x30] sm:$0xff] }
 0x185   : > { %v4067_v15 = vpack.c.bf16 %v3524_v14, %v3523_v13  ;;  %v3518_v39 = vld [vmem:[%s4603_s28 + $0x38] sm:$0xff]  ;;  %v3553_v13 = vld [vmem:[%s5065_s13 + $0x48] sm:$0xff] }
 0x186   : > { %v4685_v43 = vadd.f32 %v871_v40, %v864_v41  ;;  %v857_v44 = vmul.f32 %v3495_v35, %v849_v42  ;;  %v4059_v41 = vpack.c.bf16 %v3518_v39, %v3517_v38 }
 0x188   : > { %3767 = vmatprep.mubr.msk.f32.mxu1 %vm822_vm1, %v4685_v43  ;;  %v865_v48 = vadd.f32 %v3496_v37, %v857_v44 }
 0x18a   : > { %v4691_v49 = vadd.f32 %v876_v45, %v865_v48 }
 0x18c   : > { %3768 = vmatmul.mubr.msk.f32.vlgmr.msra.gmra.mrb[0].mxu1 %vm822_vm1, %v4691_v49 }
 0x18d   : > { %4024 = vmatpush3.bf16.msra.mxu1 %v4021_v27  ;;  %3778 = vmatprep.mubr.msk.f32.mxu1 %vm822_vm1, %v4685_v43 }
 0x18e   : > { %4026 = vmatprep.subr.bf16.mxu1 %v4025_v50 }
 0x191   : > { %4028 = vmatpush3.bf16.msra.mxu1 %v4025_v50  ;;  %v3527_v50 = vld [vmem:[%s5068_s24 + $0x10] sm:$0xff] }
 0x192   : > { %4030 = vmatprep.subr.bf16.mxu1 %v4029_v53 }
 0x194   : > { %3779 = vmatmul.mubr.msk.f32.vlgmr.msra.gmra.mrb[2].mxu1 %vm822_vm1, %v4691_v49 }
 0x195   : > { %4032 = vmatpush3.bf16.msra.mxu1 %v4029_v53  ;;  %3789 = vmatprep.mubr.msk.f32.mxu1 %vm822_vm1, %v4685_v43 }
 0x196   : > { %4034 = vmatprep.subr.bf16.mxu1 %v4033_v56 }
 0x199   : > { %4036 = vmatpush3.bf16.msra.mxu1 %v4033_v56 }
 0x19c   : > { %3790 = vmatmul.mubr.msk.f32.vlgmr.msra.gmra.mrb[4].mxu1 %vm822_vm1, %v4691_v49 }
 0x25f   : > { %v3769_v57 = vpop.f32.mrb[0].mxu1 }
 0x260   : > { %v956_v58 = vpop.f32.mrb[1].mxu1 }
 0x261   : > { %3796 = vmatprep.mubr.msk.f32.mxu1 %vm1125_vm2, %v956_v58  ;;  %v3540_v58 = vld [vmem:[%s4598_s23 + $0x40] sm:$0xff] }
 0x262   : > { %v4081_v60 = vpack.c.bf16 %v3541_v59, %v3540_v58 }
 0x267   : > { %v3780_v61 = vpop.f32.mrb[2].mxu1 }
 0x268   : > { %v1035_v62 = vpop.f32.mrb[3].mxu1 }
 0x269   : > { %v4037_v0 = vpack.c.bf16 %v3780_v61, %v1035_v62 }
 0x26b   : > { %4039 = vmatprep.subr.msk.bf16.mxu1 %vm4712_vm3, %v4037_v0 }
 0x26c   : > { %4042 = vmatpush3.bf16.xpose.msk.msra.mxu1 %vm4712_vm3, %v4037_v0 }
 0x26d   : > { %4048 = vmatprep.subr.bf16.mxu1 %v4047_v1 }
 0x26f   : > { %v3791_v6 = vpop.f32.mrb[4].mxu1 }
 0x270   : > { %v1114_v7 = vpop.f32.mrb[5].mxu1 }
 0x271   : > { %v4043_v8 = vpack.c.bf16 %v3791_v6, %v1114_v7  ;;  %v3542_v7 = vld [vmem:[%s4598_s23 + $0x50] sm:$0xff] }
 0x273   : > { %3797 = vmatmul.mubr.msk.f32.vlgmr.msra.gmra.mrb[6].mxu1 %vm1125_vm2, %v3769_v57  ;;  %4044 = vmatprep.subr.bf16.mxu0 %v4043_v8 }
 0x274   : > { %4046 = vmatpush3.bf16.msra.mxu0 %v4043_v8  ;;  %4050 = vmatpush3.bf16.msra.mxu1 %v4047_v1  ;;  %v3543_v8 = vld [vmem:[%s4598_s23 + $0x58] sm:$0xff] }
 0x275   : > { %3814 = vmatprep.mubr.msk.f32.mxu1 %vm822_vm1, %v4685_v43  ;;  %4052 = vmatprep.subr.bf16.mxu1 %v4051_v9  ;;  %v4085_v10 = vpack.c.bf16 %v3543_v8, %v3542_v7 }
 0x276   : > { %4056 = vmatprep.subr.bf16.mxu0 %v4055_v31 }
 0x278   : > { %4054 = vmatpush3.bf16.msra.mxu1 %v4051_v9 }
 0x279   : > { %4064 = vmatprep.subr.bf16.mxu1 %v4063_v12 }
 0x27b   : > { %3815 = vmatmul.mubr.msk.f32.vlgmr.msra.gmra.mrb[8].mxu1 %vm822_vm1, %v4691_v49 }
 0x27c   : > { %4066 = vmatpush3.bf16.msra.mxu1 %v4063_v12  ;;  %3836 = vmatprep.mubr.msk.f32.mxu1 %vm822_vm1, %v4685_v43  ;;  %v3552_v12 = vld [vmem:[%s5065_s13 + $0x40] sm:$0xff] }
 0x27d   : > { %4068 = vmatprep.subr.bf16.mxu1 %v4067_v15 }
 0x280   : > { %4070 = vmatpush3.bf16.msra.mxu1 %v4067_v15  ;;  %v4097_v15 = vpack.c.bf16 %v3553_v13, %v3552_v12 }
 0x283   : > { %3837 = vmatmul.mubr.msk.f32.vlgmr.msra.gmra.mrb[10].mxu1 %vm822_vm1, %v4691_v49 }
 0x346   : > { %v3798_v18 = vpop.f32.mrb[6].mxu1 }
 0x347   : > { %v1210_v19 = vadd.f32 %v3798_v18, %v1124_v16  ;;  %v1204_v20 = vpop.f32.mrb[7].mxu1  ;;  %v3554_v16 = vld [vmem:[%s5065_s13 + $0x50] sm:$0xff] }
 0x348   : > { %v1205_v21 = vadd.f32 %v1204_v20, %v1123_v17  ;;  %v3555_v17 = vld [vmem:[%s5065_s13 + $0x58] sm:$0xff] }
 0x349   : > { %v1217_v22 = vsel %vm1213_vm4, %v1210_v19, -inf }
 0x34a   : > { %1218 = vmax.xlane.f32.xlu0 %v1217_v22  ;;  %v1214_v23 = vsel %vm1213_vm4, %v1205_v21, -inf  ;;  %v1317_v22 = vld [vmem:[%s5069_s22] sm:$0xff] }
 0x34b   : > { %1215 = vmax.xlane.f32.xlu1 %v1214_v23 }
 0x34e   : > { %v3816_v24 = vpop.f32.mrb[8].mxu1 }
 0x34f   : > { %v1389_v25 = vpop.f32.mrb[9].mxu1 }
 0x356   : > { %v3838_v26 = vpop.f32.mrb[10].mxu1 }
 0x357   : > { %v1549_v27 = vpop.f32.mrb[11].mxu1 }
 0x358   : > { %v4077_v28 = vpack.c.bf16 %v3838_v26, %v1549_v27 }
 0x35a   : > { %4078 = vmatprep.subr.bf16.mxu1 %v4077_v28 }
 0x35b   : > { %4080 = vmatpush3.bf16.msra.mxu1 %v4077_v28 }
 0x35c   : > { %4082 = vmatprep.subr.bf16.mxu1 %v4081_v60 }
 0x3d7   : > { %v1219_v32 = vpop.xlane.xlu0 %1218 }
 0x3d8   : > { %v1221_v33 = vsub.f32 %v1210_v19, %v1219_v32  ;;  %v1216_v34 = vpop.xlane.xlu1 %1215  ;;  %v4101_v19 = vpack.c.bf16 %v3555_v17, %v3554_v16  ;;  %v3581_v16 = vld [vmem:[%s5065_s13 + $0x60] sm:$0xff]  ;;  %v3582_v17 = vld [vmem:[%s5065_s13 + $0x68] sm:$0xff] }
 0x3d9   : > { %v1220_v35 = vsub.f32 %v1205_v21, %v1216_v34  ;;  %v3535_v21 = vld [vmem:[%s5069_s22 + $0x8] sm:$0xff] }
 0x3da   : > { %v1224_v36 = vmul.f32 1.442695, %v1221_v33 }
 0x3db   : > { %v1222_v37 = vmul.f32 1.442695, %v1220_v35 }
 0x3dd   : > { %4275 = vpow2.f32 %v1222_v37 }
 0x3de   : > { %4277 = vpow2.f32 %v1224_v36  ;;  %v4089_v36 = vpack.c.bf16 %v3547_v30, %v3546_v29  ;;  %v3577_v29 = vld [vmem:[%s4603_s28 + $0x70] sm:$0xff]  ;;  %v3578_v30 = vld [vmem:[%s4603_s28 + $0x78] sm:$0xff] }
 0x3e7   : > { %v4276_v40 = vpop.eup %4275 }
 0x3e8   : > { %v4743_v42 = vpop.eup %4277  ;;  %3803 = vmatprep.mubr.msk.f32.mxu0 %vm1213_vm4, %v4276_v40  ;;  %v1226_v18 = vsel %vm1213_vm4, %v4276_v40, 0.0  ;;  %v3548_v40 = vld [vmem:[%s4603_s28 + $0x50] sm:$0xff] }
 0x3e9   : > { %3804 = vmatmul.mubr.msk.f32.vlgmr.msra.gmra.mrb[0].mxu0 %vm1213_vm4, %v4743_v42  ;;  %v1229_v20 = vsel %vm1213_vm4, %v4743_v42, 0.0 }
 0x3ea   : > { %4058 = vmatpush3.bf16.msra.mxu0 %v4055_v31  ;;  %3825 = vmatprep.mubr.msk.f32.mxu0 %vm822_vm1, %v4685_v43 }
 0x3eb   : > { %4060 = vmatprep.subr.bf16.mxu0 %v4059_v41 }
 0x3ee   : > { %4062 = vmatpush3.bf16.msra.mxu0 %v4059_v41  ;;  %v3549_v41 = vld [vmem:[%s4603_s28 + $0x58] sm:$0xff] }
 0x3f1   : > { %3826 = vmatmul.mubr.msk.f32.vlgmr.msra.gmra.mrb[2].mxu0 %vm822_vm1, %v4691_v49 }
 0x3f2   : > { %3843 = vmatprep.mubr.msk.f32.mxu0 %vm1125_vm2, %v1389_v25 }
 0x4bc   : > { %v4753_v44 = vpop.f32.mrb[0].mxu0 }
 0x4bd   : > { %v4755_v45 = vpop.f32.mrb[1].mxu0 }
 0x4c4   : > { %v3827_v46 = vpop.f32.mrb[2].mxu0 }
 0x4c5   : > { %v1469_v47 = vpop.f32.mrb[3].mxu0 }
 0x4c6   : > { %v4071_v48 = vpack.c.bf16 %v3827_v46, %v1469_v47  ;;  %v4093_v47 = vpack.c.bf16 %v3549_v41, %v3548_v40 }
 0x4c8   : > { %4073 = vmatprep.subr.msk.bf16.mxu0 %vm4712_vm3, %v4071_v48 }
 0x4c9   : > { %4076 = vmatpush3.bf16.xpose.msk.msra.mxu0 %vm4712_vm3, %v4071_v48 }
 0x4ca   : > { %3853 = vmatprep.subr.mxu0 %v3535_v21 }
 0x4d0   : > { %3844 = vmatmul.mubr.msk.f32.vlgmr.msra.gmra.mrb[4].mxu0 %vm1125_vm2, %v3816_v24 }
 0x4d1   : > { %3854 = vmatpush3.msra.mxu0 %v3535_v21 }
 0x4d2   : > { %3858 = vmatprep.subr.mxu0 %v1317_v22 }
 0x5a3   : > { %v3845_v51 = vpop.f32.mrb[4].mxu0 }
 0x5a4   : > { %v1639_v53 = vpop.f32.mrb[5].mxu0  ;;  %v1645_v55 = vadd.f32 %v3845_v51, %v3528_v52 }
 0x5a5   : > { %v1640_v54 = vadd.f32 %v3527_v50, %v1639_v53  ;;  %v3559_v53 = vld [vmem:[%s5068_s24 + $0x28] sm:$0xff] }
 0x5a6   : > { %v1651_v57 = vsel %vm1213_vm4, %v1645_v55, -inf }
 0x5a7   : > { %v1648_v56 = vsel %vm1213_vm4, %v1640_v54, -inf }
 0x5a8   : > { %1649 = vmax.xlane.f32.xlu1 %v1648_v56 }
 0x5ac   : > { %1652 = vmax.xlane.f32.xlu1 %v1651_v57 }
 0x635   : > { %v1650_v61 = vpop.xlane.xlu1 %1649 }
 0x636   : > { %v1654_v62 = vsub.f32 %v1640_v54, %v1650_v61  ;;  %v3558_v54 = vld [vmem:[%s5068_s24 + $0x20] sm:$0xff] }
 0x637   : > { %v3569_v61 = vld [vmem:[%s4598_s23 + $0x60] sm:$0xff] }
 0x638   : > { %v1656_v0 = vmul.f32 1.442695, %v1654_v62  ;;  %v3570_v62 = vld [vmem:[%s4598_s23 + $0x68] sm:$0xff] }
 0x639   : > { %v1653_v1 = vpop.xlane.xlu1 %1652 }
 0x63a   : > { %4279 = vpow2.f32 %v1656_v0  ;;  %v1655_v4 = vsub.f32 %v1645_v55, %v1653_v1  ;;  %v4115_v0 = vpack.c.bf16 %v3570_v62, %v3569_v61  ;;  %v3595_v62 = vld [vmem:[%s5069_s22 + $0x18] sm:$0xff] }
 0x63c   : > { %v1658_v5 = vmul.f32 1.442695, %v1655_v4 }
 0x63e   : > { %4281 = vpow2.f32 %v1658_v5 }
 0x644   : > { %v4280_v6 = vpop.eup %4279 }
 0x645   : > { %3850 = vmatprep.mubr.msk.f32.mxu1 %vm1213_vm4, %v4280_v6  ;;  %v1660_v9 = vsel %vm1213_vm4, %v4280_v6, 0.0 }
 0x646   : > { %1661 = vadd.xlane.f32.xlu1 %v1660_v9  ;;  %v3571_v9 = vld [vmem:[%s4598_s23 + $0x70] sm:$0xff] }
 0x648   : > { %v4282_v11 = vpop.eup %4281 }
 0x649   : > { %3851 = vmatmul.mubr.msk.f32.vlgmr.msra.gmra.mrb[12].mxu1 %vm1213_vm4, %v4282_v11  ;;  %v1663_v14 = vsel %vm1213_vm4, %v4282_v11, 0.0 }
 0x64a   : > { %4084 = vmatpush3.bf16.msra.mxu1 %v4081_v60  ;;  %3871 = vmatprep.mubr.msk.f32.mxu1 %vm822_vm1, %v4685_v43 }
 0x64b   : > { %1664 = vadd.xlane.f32.xlu1 %v1663_v14  ;;  %4086 = vmatprep.subr.bf16.mxu1 %v4085_v10 }
 0x64e   : > { %4088 = vmatpush3.bf16.msra.mxu1 %v4085_v10  ;;  %v3572_v10 = vld [vmem:[%s4598_s23 + $0x78] sm:$0xff] }
 0x64f   : > { %1227 = vadd.xlane.f32.xlu1 %v1226_v18  ;;  %4098 = vmatprep.subr.bf16.mxu1 %v4097_v15  ;;  %v4119_v14 = vpack.c.bf16 %v3572_v10, %v3571_v9  ;;  %v4131_v18 = vpack.c.bf16 %v3582_v17, %v3581_v16  ;;  %v3598_v10 = vld [vmem:[%s5070_s20] ss:$0 sm:$0xff] }
 0x651   : > { %3872 = vmatmul.mubr.msk.f32.vlgmr.msra.gmra.mrb[14].mxu1 %vm822_vm1, %v4691_v49 }
 0x652   : > { %4100 = vmatpush3.bf16.msra.mxu1 %v4097_v15  ;;  %3893 = vmatprep.mubr.msk.f32.mxu1 %vm822_vm1, %v4685_v43 }
 0x653   : > { %1230 = vadd.xlane.f32.xlu1 %v1229_v20  ;;  %4102 = vmatprep.subr.bf16.mxu1 %v4101_v19  ;;  %v3584_v20 = vld [vmem:[%s5065_s13 + $0x78] sm:$0xff] }
 0x656   : > { %4104 = vmatpush3.bf16.msra.mxu1 %v4101_v19  ;;  %v3583_v19 = vld [vmem:[%s5065_s13 + $0x70] sm:$0xff] }
 0x657   : > { %v4135_v21 = vpack.c.bf16 %v3584_v20, %v3583_v19 }
 0x659   : > { %3894 = vmatmul.mubr.msk.f32.vlgmr.msra.gmra.mrb[16].mxu1 %vm822_vm1, %v4691_v49 }
 0x6d3   : > { %v1662_v23 = vpop.xlane.xlu1 %1661 }
 0x6d4   : > { %4283 = vrcp.f32 %v1662_v23  ;;  %v3575_v23 = vld [vmem:[%s4603_s28 + $0x60] sm:$0xff] }
 0x6d8   : > { %v1665_v24 = vpop.xlane.xlu1 %1664 }
 0x6dc   : > { %v1228_v25 = vpop.xlane.xlu1 %1227 }
 0x6dd   : > { %4285 = vrcp.f32 %v1228_v25 }
 0x6de   : > { %4287 = vrcp.f32 %v1665_v24  ;;  %v4284_v27 = vpop.eup %4283  ;;  %v3576_v24 = vld [vmem:[%s4603_s28 + $0x68] sm:$0xff] }
 0x6df   : > { %v4123_v25 = vpack.c.bf16 %v3576_v24, %v3575_v23 }
 0x6e0   : > { %v1231_v26 = vpop.xlane.xlu1 %1230 }
 0x6e1   : > { %4289 = vrcp.f32 %v1231_v26 }
 0x6e7   : > { %v4286_v31 = vpop.eup %4285 }
 0x6e8   : > { %v4288_v33 = vpop.eup %4287  ;;  %v1315_v37 = vmul.f32 %v4286_v31, %v4755_v45 }
 0x6eb   : > { %v4290_v38 = vpop.eup %4289 }
 0x6ec   : > { %v1316_v46 = vmul.f32 %v4290_v38, %v4753_v44 }
 0x71c   : > { %v3852_v28 = vpop.f32.mrb[12].mxu1 }
 0x71d   : > { %v1738_v32 = vpop.f32.mrb[13].mxu1  ;;  %v1750_v35 = vmul.f32 %v4288_v33, %v3852_v28 }
 0x71e   : > { %v1749_v34 = vmul.f32 %v4284_v27, %v1738_v32 }
 0x720   : > { %3855 = vmatprep.mubr.msk.f32.mxu0 %vm1125_vm2, %v1749_v34 }
 0x721   : > { %3856 = vmatmul.mubr.msk.f32.vlgmr.msra.gmra.mrb[6].mxu0 %vm1125_vm2, %v1750_v35 }
 0x722   : > { %3859 = vmatpush3.msra.mxu0 %v1317_v22  ;;  %3860 = vmatprep.mubr.msk.f32.mxu0 %vm1125_vm2, %v1315_v37  ;;  %v3566_v22 = vld [vmem:[%s5069_s22 + $0x10] sm:$0xff] }
 0x723   : > { %4090 = vmatprep.subr.bf16.mxu0 %v4089_v36 }
 0x724   : > { %v3873_v39 = vpop.f32.mrb[14].mxu1 }
 0x725   : > { %v1986_v42 = vpop.f32.mrb[15].mxu1 }
 0x729   : > { %3861 = vmatmul.mubr.msk.f32.vlgmr.msra.gmra.mrb[6].mxu0 %vm1125_vm2, %v1316_v46 }
 0x72a   : > { %4092 = vmatpush3.bf16.msra.mxu0 %v4089_v36  ;;  %3882 = vmatprep.mubr.msk.f32.mxu0 %vm822_vm1, %v4685_v43  ;;  %v4127_v36 = vpack.c.bf16 %v3578_v30, %v3577_v29  ;;  %v3008_v30 = vld [vmem:[%s4637_s15 + $0x10] sm:$0xff] }
 0x72b   : > { %4094 = vmatprep.subr.bf16.mxu0 %v4093_v47 }
 0x72c   : > { %v3895_v45 = vpop.f32.mrb[16].mxu1 }
 0x72d   : > { %v2146_v48 = vpop.f32.mrb[17].mxu1 }
 0x72e   : > { %v4111_v50 = vpack.c.bf16 %v3895_v45, %v2146_v48  ;;  %4096 = vmatpush3.bf16.msra.mxu0 %v4093_v47 }
 0x730   : > { %4112 = vmatprep.subr.bf16.mxu1 %v4111_v50 }
 0x731   : > { %3883 = vmatmul.mubr.msk.f32.vlgmr.msra.gmra.mrb[8].mxu0 %vm822_vm1, %v4691_v49  ;;  %4114 = vmatpush3.bf16.msra.mxu1 %v4111_v50 }
 0x732   : > { %3900 = vmatprep.mubr.msk.f32.mxu0 %vm1125_vm2, %v1986_v42  ;;  %4116 = vmatprep.subr.bf16.mxu1 %v4115_v0 }
 0x804   : > { %v3884_v44 = vpop.f32.mrb[8].mxu0 }
 0x805   : > { %v2066_v51 = vpop.f32.mrb[9].mxu0 }
 0x806   : > { %v4105_v52 = vpack.c.bf16 %v3884_v44, %v2066_v51 }
 0x808   : > { %4107 = vmatprep.subr.msk.bf16.mxu0 %vm4712_vm3, %v4105_v52 }
 0x809   : > { %4110 = vmatpush3.bf16.xpose.msk.msra.mxu0 %vm4712_vm3, %v4105_v52 }
 0x80a   : > { %3910 = vmatprep.subr.mxu0 %v3566_v22 }
 0x810   : > { %3901 = vmatmul.mubr.msk.f32.vlgmr.msra.gmra.mrb[10].mxu0 %vm1125_vm2, %v3873_v39 }
 0x811   : > { %3911 = vmatpush3.msra.mxu0 %v3566_v22 }
 0x812   : > { %4124 = vmatprep.subr.bf16.mxu0 %v4123_v25 }
 0x8e3   : > { %v3902_v55 = vpop.f32.mrb[10].mxu0 }
 0x8e4   : > { %v2242_v56 = vadd.f32 %v3902_v55, %v3559_v53  ;;  %v2236_v57 = vpop.f32.mrb[11].mxu0 }
 0x8e5   : > { %v2237_v58 = vadd.f32 %v3558_v54, %v2236_v57 }
 0x8e6   : > { %v2248_v59 = vsel %vm1213_vm4, %v2242_v56, -inf }
 0x8e7   : > { %2249 = vmax.xlane.f32.xlu1 %v2248_v59  ;;  %v2245_v60 = vsel %vm1213_vm4, %v2237_v58, -inf }
 0x8e8   : > { %2246 = vmax.xlane.f32.xlu0 %v2245_v60 }
 0x974   : > { %v2250_v1 = vpop.xlane.xlu1 %2249 }
 0x975   : > { %v2252_v4 = vsub.f32 %v2242_v56, %v2250_v1  ;;  %v2247_v5 = vpop.xlane.xlu0 %2246 }
 0x976   : > { %v2251_v6 = vsub.f32 %v2237_v58, %v2247_v5 }
 0x977   : > { %v2255_v7 = vmul.f32 1.442695, %v2252_v4 }
 0x978   : > { %v2253_v8 = vmul.f32 1.442695, %v2251_v6 }
 0x979   : > { %4291 = vpow2.f32 %v2255_v7 }
 0x97a   : > { %4293 = vpow2.f32 %v2253_v8 }
 0x983   : > { %v4292_v11 = vpop.eup %4291 }
 0x984   : > { %v4294_v12 = vpop.eup %4293  ;;  %v2260_v13 = vsel %vm1213_vm4, %v4292_v11, 0.0 }
 0x985   : > { %2261 = vadd.xlane.f32.xlu1 %v2260_v13  ;;  %3907 = vmatprep.mubr.msk.f32.mxu1 %vm1213_vm4, %v4294_v12  ;;  %v2257_v15 = vsel %vm1213_vm4, %v4294_v12, 0.0 }
 0x986   : > { %3908 = vmatmul.mubr.msk.f32.vlgmr.msra.gmra.mrb[18].mxu1 %vm1213_vm4, %v4292_v11  ;;  %2258 = vadd.xlane.f32.xlu0 %v2257_v15 }
 0x987   : > { %4118 = vmatpush3.bf16.msra.mxu1 %v4115_v0  ;;  %3923 = vmatprep.mubr.msk.f32.mxu1 %vm822_vm1, %v4685_v43 }
 0x988   : > { %4120 = vmatprep.subr.bf16.mxu1 %v4119_v14 }
 0x98b   : > { %4122 = vmatpush3.bf16.msra.mxu1 %v4119_v14 }
 0x98c   : > { %4132 = vmatprep.subr.bf16.mxu1 %v4131_v18 }
 0x98e   : > { %3924 = vmatmul.mubr.msk.f32.vlgmr.msra.gmra.mrb[20].mxu1 %vm822_vm1, %v4691_v49 }
 0x98f   : > { %4134 = vmatpush3.bf16.msra.mxu1 %v4131_v18  ;;  %3945 = vmatprep.mubr.msk.f32.mxu1 %vm822_vm1, %v4685_v43 }
 0x990   : > { %4136 = vmatprep.subr.bf16.mxu1 %v4135_v21 }
 0x993   : > { %4138 = vmatpush3.bf16.msra.mxu1 %v4135_v21 }
 0x996   : > { %3946 = vmatmul.mubr.msk.f32.vlgmr.msra.gmra.mrb[22].mxu1 %vm822_vm1, %v4691_v49 }
 0xa12   : > { %v2262_v27 = vpop.xlane.xlu1 %2261 }
 0xa13   : > { %v2259_v26 = vpop.xlane.xlu0 %2258 }
 0xa14   : > { %4295 = vrcp.f32 %v2259_v26 }
 0xa15   : > { %4297 = vrcp.f32 %v2262_v27  ;;  %v3006_v27 = vld [vmem:[%s4637_s15] sm:$0xff] }
 0xa1e   : > { %v4296_v31 = vpop.eup %4295 }
 0xa1f   : > { %v4298_v33 = vpop.eup %4297 }
 0xa59   : > { %v3909_v28 = vpop.f32.mrb[18].mxu1 }
 0xa5a   : > { %v2335_v32 = vpop.f32.mrb[19].mxu1  ;;  %v2347_v35 = vmul.f32 %v4298_v33, %v3909_v28  ;;  %v3007_v28 = vld [vmem:[%s4637_s15 + $0x8] sm:$0xff]  ;;  %v3109_v33 = vld [vmem:[%s4646_s4] sm:$0xff] }
 0xa5b   : > { %v2346_v34 = vmul.f32 %v4296_v31, %v2335_v32  ;;  %v4149_v29 = vpack.c.bf16 %v3007_v28, %v3006_v27  ;;  %v3009_v31 = vld [vmem:[%s4637_s15 + $0x18] sm:$0xff] }
 0xa5c   : > { %v4153_v32 = vpack.c.bf16 %v3009_v31, %v3008_v30 }
 0xa5d   : > { %3912 = vmatprep.mubr.msk.f32.mxu0 %vm1125_vm2, %v2346_v34  ;;  %v3110_v34 = vld [vmem:[%s4646_s4 + $0x8] sm:$0xff] }
 0xa5e   : > { %3913 = vmatmul.mubr.msk.f32.vlgmr.msra.gmra.mrb[6].mxu0 %vm1125_vm2, %v2347_v35  ;;  %v3111_v35 = vld [vmem:[%s4646_s4 + $0x10] sm:$0xff] }
 0xa5f   : > { %4126 = vmatpush3.bf16.msra.mxu0 %v4123_v25  ;;  %3934 = vmatprep.mubr.msk.f32.mxu0 %vm822_vm1, %v4685_v43  ;;  %v3588_v43 = vld [vmem:[%s5068_s24 + $0x38] sm:$0xff] }
 0xa60   : > { %4128 = vmatprep.subr.bf16.mxu0 %v4127_v36 }
 0xa61   : > { %v3925_v37 = vpop.f32.mrb[20].mxu1 }
 0xa62   : > { %v2504_v38 = vpop.f32.mrb[21].mxu1 }
 0xa63   : > { %4130 = vmatpush3.bf16.msra.mxu0 %v4127_v36  ;;  %v4157_v36 = vpack.c.bf16 %v3110_v34, %v3109_v33 }
 0xa66   : > { %3935 = vmatmul.mubr.msk.f32.vlgmr.msra.gmra.mrb[12].mxu0 %vm822_vm1, %v4691_v49  ;;  %v3587_v49 = vld [vmem:[%s5068_s24 + $0x30] sm:$0xff] }
 0xa67   : > { %3952 = vmatprep.mubr.msk.f32.mxu0 %vm1125_vm2, %v2504_v38 }
 0xa69   : > { %v3947_v39 = vpop.f32.mrb[22].mxu1 }
 0xa6a   : > { %v2664_v40 = vpop.f32.mrb[23].mxu1 }
 0xa6b   : > { %v4145_v41 = vpack.c.bf16 %v3947_v39, %v2664_v40  ;;  %v3113_v39 = vld [vmem:[%s4646_s4 + $0x20] sm:$0xff]  ;;  %v3114_v40 = vld [vmem:[%s4646_s4 + $0x28] sm:$0xff] }
 0xa6d   : > { %4146 = vmatprep.subr.bf16.mxu1 %v4145_v41 }
 0xa6e   : > { %4148 = vmatpush3.bf16.msra.mxu1 %v4145_v41  ;;  %v4165_v41 = vpack.c.bf16 %v3114_v40, %v3113_v39 }
 0xa6f   : > { %4150 = vmatprep.subr.bf16.mxu1 %v4149_v29 }
 0xb39   : > { %v3936_v42 = vpop.f32.mrb[12].mxu0 }
 0xb3a   : > { %v2584_v46 = vpop.f32.mrb[13].mxu0 }
 0xb3b   : > { %v4139_v47 = vpack.c.bf16 %v3936_v42, %v2584_v46 }
 0xb3d   : > { %4141 = vmatprep.subr.msk.bf16.mxu0 %vm4712_vm3, %v4139_v47 }
 0xb3e   : > { %4144 = vmatpush3.bf16.xpose.msk.msra.mxu0 %vm4712_vm3, %v4139_v47 }
 0xb3f   : > { %3962 = vmatprep.subr.mxu0 %v3595_v62 }
 0xb45   : > { %3953 = vmatmul.mubr.msk.f32.vlgmr.msra.gmra.mrb[14].mxu0 %vm1125_vm2, %v3925_v37  ;;  %v3112_v37 = vld [vmem:[%s4646_s4 + $0x18] sm:$0xff] }
 0xb46   : > { %3963 = vmatpush3.msra.mxu0 %v3595_v62  ;;  %v4161_v38 = vpack.c.bf16 %v3112_v37, %v3111_v35 }
 0xb47   : > { %4158 = vmatprep.subr.bf16.mxu0 %v4157_v36 }
 0xc18   : > { %v3954_v45 = vpop.f32.mrb[14].mxu0 }
 0xc19   : > { %v2760_v48 = vadd.f32 %v3954_v45, %v3588_v43  ;;  %v2754_v50 = vpop.f32.mrb[15].mxu0 }
 0xc1a   : > { %v2755_v44 = vadd.f32 %v3587_v49, %v2754_v50  ;;  %v3599_v50 = vld [vmem:[%s5072_s16] ss:$0 sm:$0xff] }
 0xc1b   : > { %v2766_v51 = vsel %vm1213_vm4, %v2760_v48, -inf }
 0xc1c   : > { %2767 = vmax.xlane.f32.xlu1 %v2766_v51  ;;  %v2763_v52 = vsel %vm1213_vm4, %v2755_v44, -inf }
 0xc1d   : > { %2764 = vmax.xlane.f32.xlu0 %v2763_v52 }
 0xca9   : > { %v2768_v53 = vpop.xlane.xlu1 %2767 }
 0xcaa   : > { %v2770_v54 = vsub.f32 %v2760_v48, %v2768_v53  ;;  %v2765_v55 = vpop.xlane.xlu0 %2764  ;;  %v3600_v53 = vld [vmem:[%s791_s14] ss:$0 sm:$0xff] }
 0xcab   : > { %v2769_v63 = vsub.f32 %v2755_v44, %v2765_v55 }
 0xcac   : > { %v2773_v56 = vmul.f32 1.442695, %v2770_v54 }
 0xcad   : > { %v2771_v57 = vmul.f32 1.442695, %v2769_v63 }
 0xcae   : > { %4299 = vpow2.f32 %v2773_v56 }
 0xcaf   : > { %4301 = vpow2.f32 %v2771_v57  ;;  %v3115_v57 = vld [vmem:[%s4646_s4 + $0x30] sm:$0xff] }
 0xcb8   : > { %v4300_v58 = vpop.eup %4299 }
 0xcb9   : > { %v4302_v59 = vpop.eup %4301  ;;  %v2778_v60 = vsel %vm1213_vm4, %v4300_v58, 0.0 }
 0xcba   : > { %2779 = vadd.xlane.f32.xlu1 %v2778_v60  ;;  %3959 = vmatprep.mubr.msk.f32.mxu1 %vm1213_vm4, %v4302_v59  ;;  %v2775_v61 = vsel %vm1213_vm4, %v4302_v59, 0.0  ;;  %v3117_v60 = vld [vmem:[%s4646_s4 + $0x40] sm:$0xff] }
 0xcbb   : > { %3960 = vmatmul.mubr.msk.f32.vlgmr.msra.gmra.mrb[24].mxu1 %vm1213_vm4, %v4300_v58  ;;  %2776 = vadd.xlane.f32.xlu0 %v2775_v61  ;;  %v3116_v58 = vld [vmem:[%s4646_s4 + $0x38] sm:$0xff]  ;;  %v3118_v61 = vld [vmem:[%s4646_s4 + $0x48] sm:$0xff] }
 0xcbc   : > { %4152 = vmatpush3.bf16.msra.mxu1 %v4149_v29  ;;  %v4169_v59 = vpack.c.bf16 %v3116_v58, %v3115_v57  ;;  %v4173_v62 = vpack.c.bf16 %v3118_v61, %v3117_v60 }
 0xcbd   : > { %4154 = vmatprep.subr.bf16.mxu1 %v4153_v32 }
 0xcc0   : > { %4156 = vmatpush3.bf16.msra.mxu1 %v4153_v32 }
 0xd47   : > { %v2780_v1 = vpop.xlane.xlu1 %2779 }
 0xd48   : > { %v2777_v0 = vpop.xlane.xlu0 %2776 }
 0xd49   : > { %4303 = vrcp.f32 %v2777_v0  ;;  %v3119_v0 = vld [vmem:[%s4646_s4 + $0x50] sm:$0xff] }
 0xd4a   : > { %4305 = vrcp.f32 %v2780_v1  ;;  %v3120_v1 = vld [vmem:[%s4646_s4 + $0x58] sm:$0xff] }
 0xd53   : > { %v4304_v5 = vpop.eup %4303 }
 0xd54   : > { %v4306_v7 = vpop.eup %4305 }
 0xd8e   : > { %v3961_v4 = vpop.f32.mrb[24].mxu1 }
 0xd8f   : > { %v2853_v6 = vpop.f32.mrb[25].mxu1  ;;  %v2865_v9 = vmul.f32 %v4306_v7, %v3961_v4  ;;  %v4177_v4 = vpack.c.bf16 %v3120_v1, %v3119_v0 }
 0xd90   : > { %v2864_v8 = vmul.f32 %v4304_v5, %v2853_v6  ;;  %v3121_v5 = vld [vmem:[%s4646_s4 + $0x60] sm:$0xff]  ;;  %v3122_v6 = vld [vmem:[%s4646_s4 + $0x68] sm:$0xff] }
 0xd91   : > { %v4181_v7 = vpack.c.bf16 %v3122_v6, %v3121_v5 }
 0xd92   : > { %3964 = vmatprep.mubr.msk.f32.mxu0 %vm1125_vm2, %v2864_v8  ;;  %v3123_v8 = vld [vmem:[%s4646_s4 + $0x70] sm:$0xff] }
 0xd93   : > { %3965 = vmatmul.mubr.msk.f32.vlgmr.msra.gmra.mrb[6].mxu0 %vm1125_vm2, %v2865_v9  ;;  %v3124_v9 = vld [vmem:[%s4646_s4 + $0x78] sm:$0xff] }
 0xd94   : > { %4160 = vmatpush3.bf16.msra.mxu0 %v4157_v36 }
 0xd95   : > { %4162 = vmatprep.subr.bf16.mxu0 %v4161_v38 }
 0xd98   : > { %4164 = vmatpush3.bf16.msra.mxu0 %v4161_v38 }
 0xd99   : > { %4166 = vmatprep.subr.bf16.mxu0 %v4165_v41 }
 0xd9c   : > { %4168 = vmatpush3.bf16.msra.mxu0 %v4165_v41 }
 0xd9d   : > { %4170 = vmatprep.subr.bf16.mxu0 %v4169_v59 }
 0xda0   : > { %4172 = vmatpush3.bf16.msra.mxu0 %v4169_v59 }
 0xda1   : > { %4174 = vmatprep.subr.bf16.mxu0 %v4173_v62 }
 0xda4   : > { %4176 = vmatpush3.bf16.msra.mxu0 %v4173_v62 }
 0xda5   : > { %4178 = vmatprep.subr.bf16.mxu0 %v4177_v4 }
 0xda8   : > { %4180 = vmatpush3.bf16.msra.mxu0 %v4177_v4 }
 0xda9   : > { %4182 = vmatprep.subr.bf16.mxu0 %v4181_v7 }
 0xdac   : > { %4184 = vmatpush3.bf16.msra.mxu0 %v4181_v7 }
 0xe66   : > { %v3966_v11 = vpop.f32.mrb[6].mxu0 }
 0xe67   : > { %v2959_v12 = vadd.f32 %v3966_v11, %v3598_v10  ;;  %v2940_v13 = vpop.f32.mrb[7].mxu0  ;;  %v3601_v11 = vld [vmem:[%s799_s8] ss:$0 sm:$0xff] }
 0xe68   : > { %v2958_v14 = vadd.f32 %v3598_v10, %v2940_v13  ;;  %v4185_v10 = vpack.c.bf16 %v3124_v9, %v3123_v8 }
 0xe69   : > { %v2961_v15 = vadd.f32 %v2959_v12, %v4657_v3 }
 0xe6a   : > { %v2960_v16 = vadd.f32 %v2958_v14, %v4655_v2  ;;  %4186 = vmatprep.subr.bf16.mxu0 %v4185_v10 }
 0xe6b   : > { %v2967_v17 = vsel %vm822_vm1, %v2961_v15, 0.0  ;;  %4188 = vmatpush3.bf16.msra.mxu0 %v4185_v10 }
 0xe6c   : > { %2968 = vadd.xlane.f32.xlu1 %v2967_v17  ;;  %v2964_v18 = vsel %vm822_vm1, %v2960_v16, 0.0 }
 0xe6d   : > { %2965 = vadd.xlane.f32.xlu0 %v2964_v18 }
 0xef9   : > { %v2969_v19 = vpop.xlane.xlu1 %2968 }
 0xefa   : > { %v2971_v20 = vmul.f32 0.03125, %v2969_v19  ;;  %v2966_v21 = vpop.xlane.xlu0 %2965 }
 0xefb   : > { %v2970_v22 = vmul.f32 0.03125, %v2966_v21 }
 0xefc   : > { %v2973_v23 = vsub.f32 %v2961_v15, %v2971_v20 }
 0xefd   : > { %v2972_v24 = vsub.f32 %v2960_v16, %v2970_v22 }
 0xefe   : > { %v2975_v25 = vmul.f32 %v2973_v23, %v2973_v23 }
 0xeff   : > { %v2974_v3 = vmul.f32 %v2972_v24, %v2972_v24 }
 0xf00   : > { %v2979_v2 = vsel %vm822_vm1, %v2975_v25, 0.0 }
 0xf01   : > { %2980 = vadd.xlane.f32.xlu1 %v2979_v2  ;;  %v2976_v26 = vsel %vm822_vm1, %v2974_v3, 0.0  ;;  %v3604_v3 = vld [vmem:[%s807_s10] ss:$0 sm:$0xff] }
 0xf02   : > { %2977 = vadd.xlane.f32.xlu0 %v2976_v26 }
 0xf8e   : > { %v2981_v42 = vpop.xlane.xlu1 %2980 }
 0xf8f   : > { %v2983_v46 = vmul.f32 0.03125, %v2981_v42  ;;  %v2978_v47 = vpop.xlane.xlu0 %2977 }
 0xf90   : > { %v2982_v43 = vmul.f32 0.03125, %v2978_v47 }
 0xf91   : > { %v2985_v49 = vadd.f32 1e-05, %v2983_v46 }
 0xf92   : > { %v2984_v45 = vadd.f32 1e-05, %v2982_v43 }
 0xf93   : > { %4307 = vrsqrt.f32 %v2985_v49 }
 0xf94   : > { %4309 = vrsqrt.f32 %v2984_v45 }
 0xf9d   : > { %v4308_v48 = vpop.eup %4307 }
 0xf9e   : > { %v4310_v44 = vpop.eup %4309  ;;  %v2989_v51 = vmul.f32 %v4308_v48, %v2973_v23 }
 0xf9f   : > { %v2988_v52 = vmul.f32 %v4310_v44, %v2972_v24 }
 0xfa0   : > { %v2997_v54 = vmul.f32 %v3599_v50, %v2989_v51 }
 0xfa1   : > { %v2996_v55 = vmul.f32 %v3599_v50, %v2988_v52 }
 0xfa2   : > { %v3005_v56 = vadd.f32 %v3600_v53, %v2997_v54 }
 0xfa3   : > { %v3004_v63 = vadd.f32 %v3600_v53, %v2996_v55 }
 0xfa5   : > { %3975 = vmatprep.mubr.msk.f32.mxu1 %vm822_vm1, %v3004_v63 }
 0xfa6   : > { %3976 = vmatmul.mubr.msk.f32.vlgmr.msra.gmra.mrb[26].mxu1 %vm822_vm1, %v3005_v56 }
0x1079   : > { %v3977_v12 = vpop.f32.mrb[26].mxu1 }
0x107a   : > { %v3095_v13 = vadd.f32 %v3977_v12, %v3601_v11  ;;  %v3089_v14 = vpop.f32.mrb[27].mxu1 }
0x107b   : > { %v3090_v15 = vadd.f32 %v3601_v11, %v3089_v14 }
0x107c   : > { %v3102_v16 = vmul.f32 0.70710677, %v3095_v13  ;;  %v3099_v23 = vmul.f32 0.5, %v3095_v13 }
0x107d   : > { %v3101_v17 = vmul.f32 0.70710677, %v3090_v15  ;;  %v3098_v21 = vmul.f32 0.5, %v3090_v15 }
0x107e   : > { %4311 = verf.f32 %v3102_v16 }
0x107f   : > { %4313 = verf.f32 %v3101_v17 }
0x1088   : > { %v4312_v18 = vpop.eup %4311 }
0x1089   : > { %v4314_v19 = vpop.eup %4313  ;;  %v3106_v20 = vadd.f32 1.0, %v4312_v18 }
0x108a   : > { %v3105_v22 = vadd.f32 1.0, %v4314_v19 }
0x108b   : > { %v3108_v25 = vmul.f32 %v3106_v20, %v3099_v23 }
0x108c   : > { %v3107_v24 = vmul.f32 %v3105_v22, %v3098_v21 }
0x108e   : > { %4010 = vmatprep.mubr.f32.mxu0 %v3107_v24 }
0x108f   : > { %4011 = vmatmul.mubr.f32.vlgmr.msra.gmra.mrb[16].mxu0 %v3108_v25 }
0x1162   : > { %v4012_v2 = vpop.f32.mrb[16].mxu0  ;;  %3214 = sbr.rel (%p3605_p1) target bundleno = 4457 (0x1169), region = 92 }
0x1163   : > { %v3204_v26 = vadd.f32 %v4012_v2, %v3604_v3  ;;  %v3198_v27 = vpop.f32.mrb[17].mxu0 }
0x1164   : > { %v3199_v28 = vadd.f32 %v3604_v3, %v3198_v27 }
0x1165   : > { %v3208_v29 = vmul.f32 2.0, %v3204_v26 }
0x1166   : > { %v3207_v30 = vmul.f32 2.0, %v3199_v28 }
0x1167   : > { %3210 = vst.msk [vmem:[#allocation2 + $0x8] sm:$0xff] %vm822_vm1, %v3208_v29  ;;  %3216 = vst.msk [vmem:[%s4652_s6 + $0x8] sm:$0xff] (!%p3605_p1), %vm822_vm1, %v3208_v29 }
0x1168   : > { %3209 = vst.msk [vmem:[#allocation2] sm:$0xff] %vm822_vm1, %v3207_v30  ;;  %3215 = vst.msk [vmem:[%s4652_s6] sm:$0xff] (!%p3605_p1), %vm822_vm1, %v3207_v30 }
0x1169 PF: > { %s5076_s10 = sld [smem:[#allocation10_spill]]  ;;  %s5077_s19 = sld [smem:[#allocation7_spill]] }
0x116a   : > { %s5079_s13 = sld [smem:[#allocation33_spill]]  ;;  %s3231_s22 = sshll.u32 %s4652_s6, 4  ;;  %s4930_s22 = int_to_ptr.vmem [resolvable:$true] %s3231_s22 }
0x116b   : > { %s4315_s20 = scalar_lea.vmem %s4930_s22, 256  ;;  %s4412_s15 = smov [#allocation3]  }
0x116c   : > { %p4316_p2 = scmp.ne.s32.totalorder %s4930_s22, %s4315_s20  ;;  %s4319_s18 = sshll.u32 %s4412_s15, 4  ;;  %s4320_s18 = int_to_ptr.vmem [resolvable:$false] %s4319_s18 }
0x116d   : > { %s4321_s29 = scalar_lea.vmem %s4320_s18, 512  ;;  %p4322_p6 = scmp.lt.s32.totalorder %s4930_s22, %s4320_s18 }
0x116e   : > { %p4317_p4 = pnand %p4316_p2, %p4549_p3  ;;  %p4323_p7 = scmp.lt.s32.totalorder %s4321_s29, %s4315_s20 }
0x116f   : > { %s3618_s0 = sshll.u32 %s5076_s10, 8  ;;  %s5080_s23 = sand.u32 1, %s5077_s19  }
0x1170   : > { %s4927_s24 = scalar_lea.hbm %s5079_s13, %s3618_s0  ;;  %s4934_s28 = scalar_lea.sflag [#allocation4], %s5080_s23 }
0x1171   : > { %p4318_p5 = pneg %p4317_p4  ;;  %p4324_p8 = por %p4323_p7, %p4322_p6 }
0x1173   : > { %p4325_p10 = pnand %p4324_p8, %p4318_p5 }
0x1175   : > { %4328 = shalt.err (!%p4325_p10)
}
0x1176   : > { %s4329_s6 = scalar_lea.hbm %s4927_s24, 256  ;;  %s4333_s5 = scalar_lea.hbm %s5079_s13, 512 }
0x1177   : > { %p4330_p11 = scmp.ne.s32.totalorder %s4927_s24, %s4329_s6  ;;  %p4334_p0 = scmp.lt.u32.totalorder %s4927_s24, %s5079_s13 }
0x1178   : > { %p4335_p1 = scmp.lt.u32.totalorder %s4333_s5, %s4329_s6  ;;  %p4337_p4 = scmp.lt.u32.totalorder %s4329_s6, %s4927_s24 }
0x1179   : > { %p4331_p12 = pnand %p4330_p11, %p4549_p3 }
0x117a   : > { %p4336_p2 = por %p4335_p1, %p4334_p0 }
0x117b   : > { %p4332_p13 = pneg %p4331_p12 }
0x117c   : > { %p4338_p5 = por %p4337_p4, %p4336_p2 }
0x117e   : > { %p4339_p6 = pnand %p4338_p5, %p4332_p13 }
0x1180   : > { %4342 = shalt.err (!%p4339_p6)
}
0x1181   : > { %s4413_s25 = smov 128   ;;  %s4414_s4 = smov 8  }
0x1182   : > { %4195 = dma.vmem_to_hbm [thread:$0]  (%p4549_p3), %s4930_s22, 256, %s4927_s24, %s4934_s28, %s4413_s25, %s4413_s25, %s4414_s4  }
0x1183 PF: > { %s5081_s8 = sld [smem:[#allocation13_spill]]  ;;  %s5082_s1 = sld [smem:[#allocation6_spill]] }
0x1189   : > { %p4201_p7 = scmp.ge.s32.totalorder %s5081_s8, 2  ;;  %s3246_s10 = sand.u32 1, %s5082_s1  }
0x118a   : > { %s3247_s19 = scalar_lea.sflag [#allocation4], %s3246_s10 }
0x118b   : > { %p4198_p8 = pnand %p4201_p7, %p4559_p9 }
0x118d   : > { %4376 = dma.done.wait (!%p4198_p8), %s3247_s19, 256  }
0x118e   : > { %4378 = vsyncadd (!%p4198_p8), %s3247_s19, 4294967040  ;;  %s29_s28 = sadd.s32 1, %s5081_s8   ;;  %s5084_s21 = sld [smem:[#allocation7_spill]] }
0x118f   : > { %p26_p10 = scmp.ge.s32.totalorder %s29_s28, 6   ;;  %s5085_s22 = sld [smem:[#allocation8_spill]] }
0x1190   : > { %s5086_s23 = sld [smem:[#allocation18_spill]]  ;;  %s5087_s24 = sld [smem:[#allocation11_spill]] }
0x1191   : > { %s5088_s25 = sld [smem:[#allocation12_spill]]  ;;  %s5089_s26 = sld [smem:[#allocation14_spill]] }
0x1192   : > { %s5090_s27 = sld [smem:[#allocation16_spill]]  ;;  %28 = sbr.rel (!%p26_p10) target bundleno = 18 (0x12), region = 187 }
0x1199   :  { %3252 = vsyncpa [#allocation4], 1 }
0x119a   :  { %3254 = vsyncpa [#allocation4 + $0x1], 1 }

</bundles_post_ra>
